<compile_context>
chip_gen: v7x
topology: tpu7x:2x2x1
jax: 0.10.0
libtpu: 0.0.40
codegen_flags: <defaults>
</compile_context>

<pallas_src>
import math
from functools import partial

import jax
import jax.numpy as jnp
from jax import lax
from jax.experimental import pallas as pl
from jax.experimental.pallas import tpu as pltpu

_INV_SQRT2 = 0.7071067811865476


def _round_up(x, m):
    return (x + m - 1) // m * m


def _vmem_limit_bytes():
    # v7x: 64 MiB VMEM per TensorCore -> stay <= ~48 MiB; v5e/v6e: 128 MiB -> allow ~96 MiB.
    try:
        cap = pltpu.get_tpu_info().vmem_capacity_bytes
    except Exception:
        cap = 128 * 1024 * 1024
    return int(min(cap * 3 // 4, 96 * 1024 * 1024))


# -----------------------------------------------------------------------------------------------
# Kernel 1a (small Cin): conv == one lane-dense matmul per (row-tile, Cout-tile) + BN partials.
# -----------------------------------------------------------------------------------------------
def _mm_stats_kernel(x_ref, w_ref, y_ref, stats_ref):
    acc = jnp.dot(x_ref[...], w_ref[...], preferred_element_type=jnp.float32)
    yb = acc.astype(y_ref.dtype)
    y_ref[...] = yb
    z = yb.astype(jnp.float32)                      # stats over the values that get normalized
    s = jnp.sum(z, axis=0, keepdims=True)
    q = jnp.sum(z * z, axis=0, keepdims=True)
    stats_ref[0] = jnp.concatenate([s, q], axis=0)  # (2, TO) per-tile partial


# -----------------------------------------------------------------------------------------------
# Kernel 1b (general Cin): one output-row/Cout tile; K contiguous H slices, kw via post-matmul roll.
# -----------------------------------------------------------------------------------------------
def _conv_tile_kernel(x_ref, w_ref, y_ref, stats_ref, *, K, TH, Ho, Wo):
    Wpp = x_ref.shape[3]
    Cp = x_ref.shape[4]
    TO = w_ref.shape[3]
    # f32 accumulator sized (in the wrapper) to stay vreg-resident across all K*K taps.
    acc = jnp.zeros((TH, Wpp, TO), jnp.float32)
    for kh in range(K):
        xs = x_ref[0, 0, kh:kh + TH].reshape(TH * Wpp, Cp)     # contiguous H slice, no strided copy
        for kw in range(K):
            yk = jnp.dot(xs, w_ref[kh, kw],
                         preferred_element_type=jnp.float32).reshape(TH, Wpp, TO)
            if kw:
                # acc[:, wo] += yk[:, wo + kw]: sublane rotate (XLU), garbage lands in cols >= Wo.
                yk = pltpu.roll(yk, shift=Wpp - kw, axis=1)
            acc = acc + yk
    out = acc[:, :Wo, :].astype(y_ref.dtype)
    y_ref[0, 0] = out

    # BN partials; the last row tile may contain padding rows -> mask them out of the statistics.
    row0 = pl.program_id(2) * TH
    valid = (row0 + lax.broadcasted_iota(jnp.int32, (TH, 1, 1), 0)) < Ho
    z = jnp.where(valid, out.astype(jnp.float32), 0.0)
    s = jnp.sum(z, axis=(0, 1), keepdims=True).reshape(1, TO)
    q = jnp.sum(z * z, axis=(0, 1), keepdims=True).reshape(1, TO)
    stats_ref[0, 0] = jnp.concatenate([s, q], axis=0)


# -----------------------------------------------------------------------------------------------
# Kernel 2: affine BN (precomputed per-channel scale/shift) fused with exact erf-GELU.
# -----------------------------------------------------------------------------------------------
def _norm_act_kernel(y_ref, scale_ref, shift_ref, o_ref):
    z = y_ref[...].astype(jnp.float32) * scale_ref[...] + shift_ref[...]
    o_ref[...] = (0.5 * z * (1.0 + lax.erf(z * _INV_SQRT2))).astype(o_ref.dtype)


def _norm_act(y_flat, scale, shift, vmem_limit):
    rows, Op = y_flat.shape
    if rows % 8:
        y_flat = jnp.pad(y_flat, ((0, 8 - rows % 8), (0, 0)))
        rows = y_flat.shape[0]
    TO = 256 if Op % 256 == 0 else 128
    TR = 512 if rows >= 512 else rows               # rows is a multiple of 8 here
    grid = (Op // TO, pl.cdiv(rows, TR))            # partial last row block is fine (no stats here)
    fn = pl.pallas_call(
        _norm_act_kernel,
        out_shape=jax.ShapeDtypeStruct((rows, Op), jnp.float32),
        grid_spec=pltpu.PrefetchScalarGridSpec(
            num_scalar_prefetch=0,
            grid=grid,
            in_specs=[pl.BlockSpec((TR, TO), lambda c, r: (r, c)),
                      pl.BlockSpec((1, TO), lambda c, r: (0, c)),
                      pl.BlockSpec((1, TO), lambda c, r: (0, c))],
            out_specs=pl.BlockSpec((TR, TO), lambda c, r: (r, c))),
        compiler_params=pltpu.CompilerParams(
            dimension_semantics=("parallel", "parallel"),
            vmem_limit_bytes=vmem_limit),
    )
    # TODO(synk): emit bf16 / keep NHWC here when the consumer is the next (bf16) layer.
    return fn(y_flat, scale, shift)


def conv_norm_act(x_nchw, weight, gamma, beta, *, kernel_size, stride=1, eps=1e-6, row_tile=None):
    """ConvNormAct.forward for module defaults (norm_layer='bn_2d' train-mode, act=GELU, skip=False)."""
    # TODO(synk): stride>1 / dilation>1 / groups>1 / bias / other norm_layer variants and the
    #             BatchNorm running_mean/running_var momentum update are not implemented
    #             (module defaults; DropPath is Identity for drop_path_rate=0.0).
    assert stride == 1
    N, Cin, H, W = x_nchw.shape
    Cout, Cin_w, K, K2 = weight.shape
    assert (Cin_w, K, K2) == (Cin, kernel_size, kernel_size)

    pad = math.ceil((K - stride) / 2)
    Ho = H + 2 * pad - K + 1
    Wo = W + 2 * pad - K + 1
    Op = _round_up(Cout, 128)
    TO = 256 if Op % 256 == 0 else 128         # TODO(synk): keep 128 on v5e (4x128^2 MXU)
    vmem_limit = _vmem_limit_bytes()

    # TODO(synk): accepting NHWC (ideally bf16) at the API boundary would remove this
    #             transpose/pad/cast pre-pass; NCHW f32 is kept to mirror the PyTorch module.
    x = jnp.transpose(x_nchw, (0, 2, 3, 1))                                # NHWC

    if K * K * Cin <= 128:
        # ---- small-Cin path: fold all K*K taps + Cin into a single 128-deep contraction ----
        Ck, Ckp = K * K * Cin, 128
        xpad = jnp.pad(x, ((0, 0), (pad, pad), (pad, pad), (0, 0)))
        patches = jnp.concatenate(
            [xpad[:, kh:kh + Ho, kw:kw + Wo, :] for kh in range(K) for kw in range(K)],
            axis=-1)                                                       # (N, Ho, Wo, K*K*Cin)
        R = N * Ho * Wo
        TR = 512 if R >= 512 else _round_up(R, 8)
        Rp = _round_up(R, TR)                  # zero rows: contribute nothing to the statistics
        xm = jnp.pad(patches.reshape(R, Ck),
                     ((0, Rp - R), (0, Ckp - Ck))).astype(jnp.bfloat16)
        wm = jnp.pad(jnp.transpose(weight, (2, 3, 1, 0)).reshape(Ck, Cout),
                     ((0, Ckp - Ck), (0, Op - Cout))).astype(jnp.bfloat16)

        nR, nO = Rp // TR, Op // TO
        conv_fn = pl.pallas_call(
            _mm_stats_kernel,
            out_shape=(jax.ShapeDtypeStruct((Rp, Op), jnp.bfloat16),
                       jax.ShapeDtypeStruct((nR, 2, Op), jnp.float32)),
            grid_spec=pltpu.PrefetchScalarGridSpec(
                num_scalar_prefetch=0,
                grid=(nO, nR),                 # weight tile held across the inner row loop
                in_specs=[pl.BlockSpec((TR, Ckp), lambda o, r: (r, 0)),
                          # TODO(synk): pipeline_mode=pl.Buffered(1) for the constant weight block
                          pl.BlockSpec((Ckp, TO), lambda o, r: (0, o))],
                out_specs=(pl.BlockSpec((TR, TO), lambda o, r: (r, o)),
                           pl.BlockSpec((1, 2, TO), lambda o, r: (r, 0, o)))),
            compiler_params=pltpu.CompilerParams(
                dimension_semantics=("parallel", "parallel"),
                vmem_limit_bytes=vmem_limit),
        )
        y_flat, stats = conv_fn(xm, wm)
        stats = jnp.sum(stats, axis=0)                                     # (2, Op)
        reshape_to = (N, Ho, Wo)
    else:
        # ---- general path: grid over (batch, Cout tiles, output-row tiles) with halo windows ----
        Cp = _round_up(Cin, 128)
        Wpp = _round_up(W + 2 * pad, 8)        # sublane-aligned working width
        # keep the (TH, Wpp, TO) f32 accumulator vreg-resident across the K*K taps
        TH = max(1, min(Ho, (256 * 1024) // (Wpp * TO * 4)))
        if row_tile is not None:
            TH = row_tile
        Hop = _round_up(Ho, TH)
        nH = Hop // TH
        Hneed = Hop + K - 1
        xpad = jnp.pad(x, ((0, 0), (pad, Hneed - H - pad), (pad, Wpp - W - pad),
                           (0, Cp - Cin))).astype(jnp.bfloat16)            # (N, Hneed, Wpp, Cp)
        # overlapping row windows (K-1 halo rows per tile)
        # TODO(synk): halo blocks via pl.Element / manual DMA would avoid this wrapper-side copy.
        xwin = jnp.stack([xpad[:, t * TH:t * TH + TH + K - 1] for t in range(nH)], axis=1)
        wk = jnp.pad(jnp.transpose(weight, (2, 3, 1, 0)),
                     ((0, 0), (0, 0), (0, Cp - Cin), (0, Op - Cout))).astype(jnp.bfloat16)

        THK, nO = TH + K - 1, Op // TO
        conv_fn = pl.pallas_call(
            partial(_conv_tile_kernel, K=K, TH=TH, Ho=Ho, Wo=Wo),
            out_shape=(jax.ShapeDtypeStruct((N, nH, TH, Wo, Op), jnp.bfloat16),
                       jax.ShapeDtypeStruct((N, nH, 2, Op), jnp.float32)),
            grid_spec=pltpu.PrefetchScalarGridSpec(
                num_scalar_prefetch=0,
                grid=(N, nO, nH),              # weight tile held across the inner row loop
                in_specs=[pl.BlockSpec((1, 1, THK, Wpp, Cp), lambda n, o, t: (n, t, 0, 0, 0)),
                          pl.BlockSpec((K, K, Cp, TO), lambda n, o, t: (0, 0, 0, o))],
                out_specs=(pl.BlockSpec((1, 1, TH, Wo, TO), lambda n, o, t: (n, t, 0, 0, o)),
                           pl.BlockSpec((1, 1, 2, TO), lambda n, o, t: (n, t, 0, o)))),
            compiler_params=pltpu.CompilerParams(
                dimension_semantics=("parallel", "parallel", "parallel"),
                vmem_limit_bytes=vmem_limit),
        )
        y5, stats = conv_fn(xwin, wk)
        stats = jnp.sum(stats, axis=(0, 1))                                # (2, Op)
        y_flat = y5.reshape(N * Hop * Wo, Op)                              # contiguous reshape
        reshape_to = (N, Hop, Wo)

    # BatchNorm2d default (training-mode) biased batch statistics over (N, Ho, Wo).
    count = float(N * Ho * Wo)
    mean = stats[0] / count
    var = jnp.maximum(stats[1] / count - mean * mean, 0.0)
    # TODO(synk): E[x^2]-mean^2 can cancel for very large channel means (Welford on the partials).
    gamma_p = jnp.pad(gamma.astype(jnp.float32), (0, Op - Cout))
    beta_p = jnp.pad(beta.astype(jnp.float32), (0, Op - Cout))
    scale = (gamma_p / jnp.sqrt(var + eps)).reshape(1, Op)
    shift = (beta_p - mean * scale[0]).reshape(1, Op)

    out_flat = _norm_act(y_flat, scale, shift, vmem_limit)

    Nr, Hr, Wr = reshape_to
    out = out_flat[:Nr * Hr * Wr, :Cout].reshape(Nr, Hr, Wr, Cout)[:, :Ho]
    return jnp.transpose(out, (0, 3, 1, 2))                                # back to NCHW


def _reference(x, weight, gamma, beta, *, kernel_size, stride=1, eps=1e-6):
    """Plain-JAX f32 reference mirroring the PyTorch forward (train-mode BN + exact GELU)."""
    pad = math.ceil((kernel_size - stride) / 2)
    y = lax.conv_general_dilated(x, weight, (stride, stride), [(pad, pad), (pad, pad)],
                                 dimension_numbers=("NCHW", "OIHW", "NCHW"))
    mean = jnp.mean(y, axis=(0, 2, 3), keepdims=True)
    var = jnp.var(y, axis=(0, 2, 3), keepdims=True)
    z = (y - mean) / jnp.sqrt(var + eps) * gamma[None, :, None, None] + beta[None, :, None, None]
    return 0.5 * z * (1.0 + lax.erf(z * _INV_SQRT2))


if __name__ == "__main__":
    key = jax.random.PRNGKey(0)
    k_x, k_w, k_g, k_b, k_x2, k_w2, k_g2, k_b2 = jax.random.split(key, 8)

    fn = jax.jit(conv_norm_act, static_argnames=("kernel_size", "stride", "eps", "row_tile"))

    # Config 1: module-typical small stem (small Cin -> folded-tap matmul path).
    N, Cin, H, W, Cout, K = 2, 4, 16, 16, 8, 3
    x = jax.random.normal(k_x, (N, Cin, H, W), jnp.float32)
    bound = 1.0 / math.sqrt(Cin * K * K)
    weight = jax.random.uniform(k_w, (Cout, Cin, K, K), jnp.float32, -bound, bound)
    gamma = jax.random.uniform(k_g, (Cout,), jnp.float32, 0.5, 1.5)
    beta = jax.random.uniform(k_b, (Cout,), jnp.float32, -0.1, 0.1)
    out = jax.block_until_ready(fn(x, weight, gamma, beta, kernel_size=K))
    ref = _reference(x, weight, gamma, beta, kernel_size=K)
    assert out.shape == (N, Cout, H, W), out.shape
    err = float(jnp.max(jnp.abs(out - ref)))
    assert err < 5e-2, f"small-Cin path: max abs error {err}"   # bf16 MXU vs f32 reference

    # Config 2: larger Cin -> tiled direct-conv path (halo row windows, roll taps, stats masking).
    N2, Cin2, H2, W2, Cout2, K2 = 2, 32, 9, 9, 16, 3
    x2 = jax.random.normal(k_x2, (N2, Cin2, H2, W2), jnp.float32)
    bound2 = 1.0 / math.sqrt(Cin2 * K2 * K2)
    w2 = jax.random.uniform(k_w2, (Cout2, Cin2, K2, K2), jnp.float32, -bound2, bound2)
    g2 = jax.random.uniform(k_g2, (Cout2,), jnp.float32, 0.5, 1.5)
    b2 = jax.random.uniform(k_b2, (Cout2,), jnp.float32, -0.1, 0.1)
    out2 = jax.block_until_ready(fn(x2, w2, g2, b2, kernel_size=K2, row_tile=4))
    ref2 = _reference(x2, w2, g2, b2, kernel_size=K2)
    assert out2.shape == (N2, Cout2, H2, W2), out2.shape
    err2 = float(jnp.max(jnp.abs(out2 - ref2)))
    assert err2 < 5e-2, f"general path: max abs error {err2}"

    print("KERNEL_OK")
</pallas_src>

<mosaic_0001>
module attributes {stable_mosaic.version = 11 : i64} {
  func.func @_mm_stats_kernel(%arg0: i32, %arg1: i32, %arg2: memref<512x128xbf16, #tpu.memory_space<vmem>>, %arg3: memref<128x128xbf16, #tpu.memory_space<vmem>>, %arg4: memref<512x128xbf16, #tpu.memory_space<vmem>>, %arg5: memref<1x2x128xf32, #tpu.memory_space<vmem>>) attributes {dimension_semantics = [#tpu.dimension_semantics<parallel>, #tpu.dimension_semantics<parallel>], iteration_bounds = array<i64: 1, 1>, scalar_prefetch = 0 : i64, scratch_operands = 0 : i64, tpu.core_type = #tpu.core_type<tc>, window_params = [{transform_indices = @transform_0, window_bounds = array<i64: 512, 128>}, {transform_indices = @transform_1, window_bounds = array<i64: 128, 128>}, {transform_indices = @transform_2, window_bounds = array<i64: 512, 128>}, {transform_indices = @transform_3, window_bounds = array<i64: 1, 2, 128>}]} {
    %c0 = arith.constant 0 : index
    %c0_0 = arith.constant 0 : index
    %0 = vector.load %arg2[%c0, %c0_0] : memref<512x128xbf16, #tpu.memory_space<vmem>>, vector<512x128xbf16>
    %c0_1 = arith.constant 0 : index
    %c0_2 = arith.constant 0 : index
    %1 = vector.load %arg3[%c0_1, %c0_2] : memref<128x128xbf16, #tpu.memory_space<vmem>>, vector<128x128xbf16>
    %cst = arith.constant dense<0.000000e+00> : vector<512x128xf32>
    %2 = tpu.matmul %0, %1, %cst {dimension_numbers = #tpu.dot_dimension_numbers<[1], [0], [0], [1], [0, 0, 1, 1], [], []>} : vector<512x128xbf16>, vector<128x128xbf16>, vector<512x128xf32> -> vector<512x128xf32>
    %3 = arith.truncf %2 : vector<512x128xf32> to vector<512x128xbf16>
    %c0_3 = arith.constant 0 : index
    %c0_4 = arith.constant 0 : index
    %4 = vector.load %arg4[%c0_3, %c0_4] : memref<512x128xbf16, #tpu.memory_space<vmem>>, vector<512x128xbf16>
    tpu.vector_store %arg4[%c0_3, %c0_4], %3 {strides = array<i32>} : memref<512x128xbf16, #tpu.memory_space<vmem>>, vector<512x128xbf16>,
    %5 = arith.extf %3 : vector<512x128xbf16> to vector<512x128xf32>
    %cst_5 = arith.constant dense<0.000000e+00> : vector<128xf32>
    %6 = vector.multi_reduction <add>, %5, %cst_5 [0] : vector<512x128xf32> to vector<128xf32>
    %7 = vector.shape_cast %6 : vector<128xf32> to vector<1x128xf32>
    %8 = arith.mulf %5, %5 : vector<512x128xf32>
    %cst_6 = arith.constant dense<0.000000e+00> : vector<128xf32>
    %9 = vector.multi_reduction <add>, %8, %cst_6 [0] : vector<512x128xf32> to vector<128xf32>
    %10 = vector.shape_cast %9 : vector<128xf32> to vector<1x128xf32>
    %11 = tpu.concatenate %7, %10 in 0 : vector<1x128xf32>, vector<1x128xf32> -> vector<2x128xf32>
    %c0_7 = arith.constant 0 : index
    %c0_8 = arith.constant 0 : index
    %c0_9 = arith.constant 0 : index
    %12 = vector.load %arg5[%c0_7, %c0_8, %c0_9] : memref<1x2x128xf32, #tpu.memory_space<vmem>>, vector<1x2x128xf32>
    %13 = vector.shape_cast %12 : vector<1x2x128xf32> to vector<2x128xf32>
    %14 = vector.shape_cast %11 : vector<2x128xf32> to vector<1x2x128xf32>
    tpu.vector_store %arg5[%c0_7, %c0_8, %c0_9], %14 {strides = array<i32>} : memref<1x2x128xf32, #tpu.memory_space<vmem>>, vector<1x2x128xf32>,
    return
  }
  func.func @transform_0(%arg0: i32, %arg1: i32) -> (i32, i32) {
    %c0_i32 = arith.constant 0 : i32
    %c0_i32_0 = arith.constant 0 : i32
    return %arg1, %c0_i32 : i32, i32
  }
  func.func @transform_1(%arg0: i32, %arg1: i32) -> (i32, i32) {
    %c0_i32 = arith.constant 0 : i32
    %c0_i32_0 = arith.constant 0 : i32
    return %c0_i32, %arg0 : i32, i32
  }
  func.func @transform_2(%arg0: i32, %arg1: i32) -> (i32, i32) {
    %c0_i32 = arith.constant 0 : i32
    return %arg1, %arg0 : i32, i32
  }
  func.func @transform_3(%arg0: i32, %arg1: i32) -> (i32, i32, i32) {
    %c0_i32 = arith.constant 0 : i32
    %c0_i32_0 = arith.constant 0 : i32
    return %arg1, %c0_i32, %arg0 : i32, i32, i32
  }
}

module attributes {stable_mosaic.version = 11 : i64} {
  func.func @_norm_act_kernel(%arg0: i32, %arg1: i32, %arg2: memref<512x128xbf16, #tpu.memory_space<vmem>>, %arg3: memref<1x128xf32, #tpu.memory_space<vmem>>, %arg4: memref<1x128xf32, #tpu.memory_space<vmem>>, %arg5: memref<512x128xf32, #tpu.memory_space<vmem>>) attributes {dimension_semantics = [#tpu.dimension_semantics<parallel>, #tpu.dimension_semantics<parallel>], iteration_bounds = array<i64: 1, 1>, scalar_prefetch = 0 : i64, scratch_operands = 0 : i64, tpu.core_type = #tpu.core_type<tc>, window_params = [{transform_indices = @transform_0, window_bounds = array<i64: 512, 128>}, {transform_indices = @transform_1, window_bounds = array<i64: 1, 128>}, {transform_indices = @transform_2, window_bounds = array<i64: 1, 128>}, {transform_indices = @transform_3, window_bounds = array<i64: 512, 128>}]} {
    %c0 = arith.constant 0 : index
    %c0_0 = arith.constant 0 : index
    %0 = vector.load %arg2[%c0, %c0_0] : memref<512x128xbf16, #tpu.memory_space<vmem>>, vector<512x128xbf16>
    %1 = arith.extf %0 : vector<512x128xbf16> to vector<512x128xf32>
    %c0_1 = arith.constant 0 : index
    %c0_2 = arith.constant 0 : index
    %2 = vector.load %arg3[%c0_1, %c0_2] : memref<1x128xf32, #tpu.memory_space<vmem>>, vector<1x128xf32>
    %3 = vector.broadcast %2 : vector<1x128xf32> to vector<512x128xf32>
    %4 = arith.mulf %1, %3 : vector<512x128xf32>
    %c0_3 = arith.constant 0 : index
    %c0_4 = arith.constant 0 : index
    %5 = vector.load %arg4[%c0_3, %c0_4] : memref<1x128xf32, #tpu.memory_space<vmem>>, vector<1x128xf32>
    %6 = vector.broadcast %5 : vector<1x128xf32> to vector<512x128xf32>
    %7 = arith.addf %4, %6 : vector<512x128xf32>
    %cst = arith.constant 5.000000e-01 : f32
    %8 = vector.broadcast %cst : f32 to vector<512x128xf32>
    %9 = arith.mulf %8, %7 : vector<512x128xf32>
    %cst_5 = arith.constant 0.707106769 : f32
    %10 = vector.broadcast %cst_5 : f32 to vector<512x128xf32>
    %11 = arith.mulf %7, %10 : vector<512x128xf32>
    %12 = math.erf %11 : vector<512x128xf32>
    %cst_6 = arith.constant 1.000000e+00 : f32
    %13 = vector.broadcast %cst_6 : f32 to vector<512x128xf32>
    %14 = arith.addf %13, %12 : vector<512x128xf32>
    %15 = arith.mulf %9, %14 : vector<512x128xf32>
    %c0_7 = arith.constant 0 : index
    %c0_8 = arith.constant 0 : index
    %16 = vector.load %arg5[%c0_7, %c0_8] : memref<512x128xf32, #tpu.memory_space<vmem>>, vector<512x128xf32>
    tpu.vector_store %arg5[%c0_7, %c0_8], %15 {strides = array<i32>} : memref<512x128xf32, #tpu.memory_space<vmem>>, vector<512x128xf32>,
    return
  }
  func.func @transform_0(%arg0: i32, %arg1: i32) -> (i32, i32) {
    %c0_i32 = arith.constant 0 : i32
    return %arg1, %arg0 : i32, i32
  }
  func.func @transform_1(%arg0: i32, %arg1: i32) -> (i32, i32) {
    %c0_i32 = arith.constant 0 : i32
    %c0_i32_0 = arith.constant 0 : i32
    return %c0_i32, %arg0 : i32, i32
  }
  func.func @transform_2(%arg0: i32, %arg1: i32) -> (i32, i32) {
    %c0_i32 = arith.constant 0 : i32
    %c0_i32_0 = arith.constant 0 : i32
    return %c0_i32, %arg0 : i32, i32
  }
  func.func @transform_3(%arg0: i32, %arg1: i32) -> (i32, i32) {
    %c0_i32 = arith.constant 0 : i32
    return %arg1, %arg0 : i32, i32
  }
}

</mosaic_0001>

<bundles_post_ra>
// kernel: conv_norm_act.3
= control target key start
LH: loop header
LB: loop body
LE: loop exit
PB: predicated region body
PF: predicated region fallthrough
CT: control target
= control target key end

     0   :  { %8 = vsyncpa [#allocation3], 0  ;;  %s1411_s0 = inlined_call_operand.hbm [shape: bf16[512,128], index: 0, kind: input, shape index: {}]   ;;  %s1412_s1 = inlined_call_operand.hbm [shape: f32[1,128], index: 1, kind: input, shape index: {}]   ;;  %s1413_s2 = inlined_call_operand.hbm [shape: f32[1,128], index: 2, kind: input, shape index: {}]   ;;  %s1414_s3 = inlined_call_operand.hbm [shape: f32[512,128], index: 3, kind: output, shape index: {}]  }
   0x1   :  { %9 = vsyncpa [#allocation6], 0 }
   0x2   :  { %10 = vsyncpa [#allocation4], 0  ;;  %s1117_s12 = smov [#allocation5]   ;;  %s1118_s14 = smov [#allocation2]  }
   0x3   :  { %s29_s13 = sshll.u32 %s1117_s12, 4  ;;  %s16_s15 = sshll.u32 %s1118_s14, 4  ;;  %s30_s13 = int_to_ptr.vmem [resolvable:$true] %s29_s13  ;;  %s1145_s15 = int_to_ptr.vmem [resolvable:$true] %s16_s15 }
   0x4   :  { %s1023_s18 = scalar_lea.hbm %s1412_s1, 16 }
   0x5   :  { %p1024_p0 = scmp.ne.s32.totalorder %s1412_s1, %s1023_s18  ;;  %p1027_p1 = scmp.lt.u32.totalorder %s1023_s18, %s1412_s1 }
   0x7   :  { %p1029_p2 = pnand %p1027_p1, %p1024_p0 }
   0x9   :  { %1032 = shalt.err (!%p1029_p2)
}
   0xa   :  { %s1033_s23 = scalar_lea.vmem %s30_s13, 16  ;;  %s1037_s24 = scalar_lea.vmem %s30_s13, 32 }
   0xb   :  { %p1034_p3 = scmp.ne.s32.totalorder %s30_s13, %s1033_s23  ;;  %p1038_p4 = scmp.lt.s32.totalorder %s30_s13, %s30_s13 }
   0xc   :  { %p1039_p5 = scmp.lt.s32.totalorder %s1037_s24, %s1033_s23 }
   0xe   :  { %p1040_p6 = por %p1039_p5, %p1038_p4 }
  0x10   :  { %p1041_p7 = pnand %p1040_p6, %p1034_p3 }
  0x12   :  { %1044 = shalt.err (!%p1041_p7)
}
  0x13   :  { %32 = dma.hbm_to_vmem [thread:$0]  %s1412_s1, 16, %s30_s13, [#allocation6]  }
  0x14   :  { %s1045_s29 = scalar_lea.hbm %s1411_s0, 4096 }
  0x15   :  { %p1046_p8 = scmp.ne.s32.totalorder %s1411_s0, %s1045_s29  ;;  %p1049_p9 = scmp.lt.u32.totalorder %s1045_s29, %s1411_s0 }
  0x17   :  { %p1051_p10 = pnand %p1049_p9, %p1046_p8 }
  0x19   :  { %1054 = shalt.err (!%p1051_p10)
}
  0x1a   :  { %s1055_s7 = scalar_lea.vmem %s1145_s15, 4096  ;;  %p1060_p12 = scmp.lt.s32.totalorder %s1145_s15, %s1145_s15 }
  0x1b   :  { %p1056_p11 = scmp.ne.s32.totalorder %s1145_s15, %s1055_s7  ;;  %p1061_p13 = scmp.lt.s32.totalorder %s1055_s7, %s1055_s7 }
  0x1d   :  { %p1062_p0 = por %p1061_p13, %p1060_p12 }
  0x1f   :  { %p1063_p1 = pnand %p1062_p0, %p1056_p11 }
  0x21   :  { %1066 = shalt.err (!%p1063_p1)
}
  0x22   :  { %s1119_s1 = smov 64   ;;  %s1120_s8 = smov 4  }
  0x23   :  { %22 = dma.hbm_to_vmem [thread:$0]  %s1411_s0, 4096, %s1145_s15, [#allocation3], %s1119_s1, %s1119_s1, %s1120_s8  }
  0x24   :  { %s1121_s11 = smov [#allocation7]   ;;  %s1067_s16 = scalar_lea.hbm %s1413_s2, 16 }
  0x25   :  { %s39_s12 = sshll.u32 %s1121_s11, 4  ;;  %p1068_p2 = scmp.ne.s32.totalorder %s1413_s2, %s1067_s16  ;;  %s40_s12 = int_to_ptr.vmem [resolvable:$true] %s39_s12 }
  0x26   :  { %p1071_p3 = scmp.lt.u32.totalorder %s1067_s16, %s1413_s2 }
  0x28   :  { %p1073_p4 = pnand %p1071_p3, %p1068_p2 }
  0x2a   :  { %1076 = shalt.err (!%p1073_p4)
}
  0x2b   :  { %s1077_s21 = scalar_lea.vmem %s40_s12, 16  ;;  %s1081_s0 = scalar_lea.vmem %s40_s12, 32 }
  0x2c   :  { %p1078_p5 = scmp.ne.s32.totalorder %s40_s12, %s1077_s21  ;;  %p1082_p6 = scmp.lt.s32.totalorder %s40_s12, %s40_s12 }
  0x2d   :  { %p1083_p7 = scmp.lt.s32.totalorder %s1081_s0, %s1077_s21 }
  0x2f   :  { %p1084_p8 = por %p1083_p7, %p1082_p6 }
  0x31   :  { %p1085_p9 = pnand %p1084_p8, %p1078_p5 }
  0x33   :  { %1088 = shalt.err (!%p1085_p9)
}
  0x34   :  { %42 = dma.hbm_to_vmem [thread:$0]  %s1413_s2, 16, %s40_s12, [#allocation6]  }
  0x35   :  { %1111 = dma.done.wait [#allocation3], 4096  }
  0x36   :  { %1112 = vsyncadd [#allocation3], 4294963200 }
  0x37   :  { %1113 = dma.done.wait [#allocation6], 32  }
  0x38   :  { %1114 = vsyncadd [#allocation6], 4294967264  ;;  %v727_v0 = vld [vmem:[#allocation2] sm:$0xff]   ;;  %v854_v4 = vld [vmem:[#allocation2 + $0x8] sm:$0xff]   ;;  %s1122_s2 = smov [#allocation8]  }
  0x39   :  { %v1188_v1 = vld [vmem:[#allocation5] ss:$0 sm:$0xff]  ;;  %v728_v2 = vunpack.c.l.bf16 %v727_v0  ;;  %v729_v3 = vunpack.c.h.bf16 %v727_v0  ;;  %v855_v5 = vld [vmem:[#allocation2 + $0x10] sm:$0xff]   ;;  %v856_v6 = vld [vmem:[#allocation2 + $0x18] sm:$0xff]   ;;  %v732_v8 = vunpack.c.l.bf16 %v854_v4  ;;  %v733_v9 = vunpack.c.h.bf16 %v854_v4  ;;  %s711_s23 = sshll.u32 %s1122_s2, 4  ;;  %s712_s23 = int_to_ptr.vmem [resolvable:$true] %s711_s23 }
  0x3a   :  { %v1190_v7 = vld [vmem:[#allocation7] ss:$0 sm:$0xff]  ;;  %v736_v10 = vunpack.c.l.bf16 %v855_v5  ;;  %v737_v11 = vunpack.c.h.bf16 %v855_v5  ;;  %v740_v14 = vunpack.c.l.bf16 %v856_v6  ;;  %v741_v15 = vunpack.c.h.bf16 %v856_v6  ;;  %v858_v33 = vld [vmem:[#allocation2 + $0x28] sm:$0xff]   ;;  %v859_v43 = vld [vmem:[#allocation2 + $0x30] sm:$0xff]   ;;  %s1089_s24 = scalar_lea.vmem %s712_s23, 8192  ;;  %p1094_p11 = scmp.lt.s32.totalorder %s712_s23, %s712_s23 }
  0x3b   :  { %v187_v12 = vmul.f32 %v728_v2, %v1188_v1  ;;  %v188_v13 = vmul.f32 %v729_v3, %v1188_v1  ;;  %v189_v16 = vmul.f32 %v732_v8, %v1188_v1  ;;  %v190_v17 = vmul.f32 %v733_v9, %v1188_v1  ;;  %v857_v32 = vld [vmem:[#allocation2 + $0x20] sm:$0xff]   ;;  %v860_v59 = vld [vmem:[#allocation2 + $0x38] sm:$0xff]   ;;  %p1090_p10 = scmp.ne.s32.totalorder %s712_s23, %s1089_s24  ;;  %p1095_p12 = scmp.lt.s32.totalorder %s1089_s24, %s1089_s24 }
  0x3c   :  { %v191_v18 = vmul.f32 %v736_v10, %v1188_v1  ;;  %v192_v19 = vmul.f32 %v737_v11, %v1188_v1  ;;  %v193_v22 = vmul.f32 %v740_v14, %v1188_v1  ;;  %v194_v23 = vmul.f32 %v741_v15, %v1188_v1 }
  0x3d   :  { %v258_v20 = vadd.f32 %v1190_v7, %v187_v12  ;;  %v259_v21 = vadd.f32 %v1190_v7, %v188_v13  ;;  %v260_v24 = vadd.f32 %v1190_v7, %v189_v16  ;;  %v261_v25 = vadd.f32 %v1190_v7, %v190_v17  ;;  %p1096_p13 = por %p1095_p12, %p1094_p11 }
  0x3e   :  { %v262_v26 = vadd.f32 %v1190_v7, %v191_v18  ;;  %v263_v27 = vadd.f32 %v1190_v7, %v192_v19  ;;  %v264_v38 = vadd.f32 %v1190_v7, %v193_v22  ;;  %v265_v39 = vadd.f32 %v1190_v7, %v194_v23 }
  0x3f   :  { %v386_v28 = vmul.f32 0.70710677, %v258_v20  ;;  %v387_v29 = vmul.f32 0.70710677, %v259_v21  ;;  %v388_v30 = vmul.f32 0.70710677, %v260_v24  ;;  %v744_v40 = vunpack.c.l.bf16 %v857_v32  ;;  %p1097_p0 = pnand %p1096_p13, %p1090_p10 }
  0x40   :  { %v389_v31 = vmul.f32 0.70710677, %v261_v25  ;;  %v322_v34 = vmul.f32 0.5, %v258_v20  ;;  %v323_v35 = vmul.f32 0.5, %v259_v21  ;;  %v390_v36 = vmul.f32 0.70710677, %v262_v26 }
  0x41   :  { %893 = verf.f32 %v386_v28  ;;  %v391_v37 = vmul.f32 0.70710677, %v263_v27  ;;  %v745_v41 = vunpack.c.h.bf16 %v857_v32  ;;  %v748_v42 = vunpack.c.l.bf16 %v858_v33 }
  0x42   :  { %895 = verf.f32 %v387_v29  ;;  %v324_v44 = vmul.f32 0.5, %v260_v24  ;;  %v325_v45 = vmul.f32 0.5, %v261_v25  ;;  %v392_v46 = vmul.f32 0.70710677, %v264_v38 }
  0x43   :  { %897 = verf.f32 %v388_v30  ;;  %v393_v47 = vmul.f32 0.70710677, %v265_v39  ;;  %v195_v48 = vmul.f32 %v744_v40, %v1188_v1  ;;  %v196_v49 = vmul.f32 %v745_v41, %v1188_v1  ;;  %v862_v41 = vld [vmem:[#allocation2 + $0x48] sm:$0xff]  }
  0x44   :  { %899 = verf.f32 %v389_v31  ;;  %v197_v50 = vmul.f32 %v748_v42, %v1188_v1  ;;  %v749_v51 = vunpack.c.h.bf16 %v858_v33  ;;  %v752_v52 = vunpack.c.l.bf16 %v859_v43 }
  0x45   :  { %901 = verf.f32 %v390_v36  ;;  %v266_v53 = vadd.f32 %v1190_v7, %v195_v48  ;;  %v267_v54 = vadd.f32 %v1190_v7, %v196_v49  ;;  %v753_v55 = vunpack.c.h.bf16 %v859_v43 }
  0x46   :  { %903 = verf.f32 %v391_v37  ;;  %v268_v56 = vadd.f32 %v1190_v7, %v197_v50  ;;  %v198_v57 = vmul.f32 %v749_v51, %v1188_v1  ;;  %v199_v58 = vmul.f32 %v752_v52, %v1188_v1 }
  0x47   :  { %905 = verf.f32 %v392_v46  ;;  %v326_v60 = vmul.f32 0.5, %v262_v26  ;;  %v327_v61 = vmul.f32 0.5, %v263_v27  ;;  %v394_v62 = vmul.f32 0.70710677, %v266_v53  ;;  %v861_v26 = vld [vmem:[#allocation2 + $0x40] sm:$0xff]  }
  0x48   :  { %907 = verf.f32 %v393_v47  ;;  %v395_v63 = vmul.f32 0.70710677, %v267_v54  ;;  %v328_v0 = vmul.f32 0.5, %v264_v38  ;;  %v396_v2 = vmul.f32 0.70710677, %v268_v56 }
  0x49   :  { %v1217_v3 = vadd.f32 %v1190_v7, %v198_v57  ;;  %v1220_v4 = vadd.f32 %v1190_v7, %v199_v58  ;;  %v329_v6 = vmul.f32 0.5, %v265_v39  ;;  %909 = verf.f32 %v394_v62 }
  0x4a   :  { %v200_v8 = vmul.f32 %v753_v55, %v1188_v1  ;;  %v756_v9 = vunpack.c.l.bf16 %v860_v59  ;;  %v1223_v12 = vmul.f32 0.5, %v266_v53  ;;  %911 = verf.f32 %v395_v63 }
  0x4b   :  { %v894_v5 = vpop.eup %893  ;;  %v397_v13 = vmul.f32 0.70710677, %v1217_v3  ;;  %913 = verf.f32 %v396_v2  ;;  %v398_v16 = vmul.f32 0.70710677, %v1220_v4  ;;  %v757_v17 = vunpack.c.h.bf16 %v860_v59 }
  0x4c   :  { %v896_v10 = vpop.eup %895  ;;  %v514_v11 = vadd.f32 1.0, %v894_v5  ;;  %v1228_v21 = vadd.f32 %v1190_v7, %v200_v8  ;;  %v201_v25 = vmul.f32 %v756_v9, %v1188_v1  ;;  %v331_v30 = vmul.f32 0.5, %v267_v54 }
  0x4d   :  { %v898_v14 = vpop.eup %897  ;;  %v515_v15 = vadd.f32 1.0, %v896_v10  ;;  %915 = verf.f32 %v397_v13  ;;  %v760_v40 = vunpack.c.l.bf16 %v861_v26  ;;  %v761_v49 = vunpack.c.h.bf16 %v861_v26  ;;  %v865_v26 = vld [vmem:[#allocation2 + $0x60] sm:$0xff]  }
  0x4e   :  { %v900_v18 = vpop.eup %899  ;;  %v578_v19 = vmul.f32 %v514_v11, %v322_v34  ;;  %v516_v20 = vadd.f32 1.0, %v898_v14  ;;  %917 = verf.f32 %v398_v16  ;;  %v399_v31 = vmul.f32 0.70710677, %v1228_v21 }
  0x4f   :  { %v902_v22 = vpop.eup %901  ;;  %v579_v23 = vmul.f32 %v515_v15, %v323_v35  ;;  %v517_v24 = vadd.f32 1.0, %v900_v18  ;;  %v272_v36 = vadd.f32 %v1190_v7, %v201_v25  ;;  %v202_v35 = vmul.f32 %v757_v17, %v1188_v1  ;;  %v863_v17 = vld [vmem:[#allocation2 + $0x50] sm:$0xff]  }
  0x50   :  { %v904_v27 = vpop.eup %903  ;;  %642 = vst [vmem:[#allocation8] sm:$0xff] %v578_v19  ;;  %v580_v28 = vmul.f32 %v516_v20, %v324_v44  ;;  %v518_v29 = vadd.f32 1.0, %v902_v22  ;;  %919 = verf.f32 %v399_v31  ;;  %v332_v44 = vmul.f32 0.5, %v268_v56  ;;  %v864_v19 = vld [vmem:[#allocation2 + $0x58] sm:$0xff]  }
  0x51   :  { %v906_v32 = vpop.eup %905  ;;  %643 = vst [vmem:[#allocation8 + $0x8] sm:$0xff] %v579_v23  ;;  %v581_v33 = vmul.f32 %v517_v24, %v325_v45  ;;  %v519_v34 = vadd.f32 1.0, %v904_v27  ;;  %v400_v46 = vmul.f32 0.70710677, %v272_v36  ;;  %v273_v45 = vadd.f32 %v1190_v7, %v202_v35 }
  0x52   :  { %v908_v37 = vpop.eup %907  ;;  %644 = vst [vmem:[#allocation8 + $0x10] sm:$0xff] %v580_v28  ;;  %v582_v38 = vmul.f32 %v518_v29, %v326_v60  ;;  %v520_v39 = vadd.f32 1.0, %v906_v32  ;;  %v203_v48 = vmul.f32 %v760_v40, %v1188_v1  ;;  %v764_v52 = vunpack.c.l.bf16 %v862_v41  ;;  %v866_v40 = vld [vmem:[#allocation2 + $0x68] sm:$0xff]  }
  0x53   :  { %645 = vst [vmem:[#allocation8 + $0x18] sm:$0xff] %v581_v33  ;;  %v583_v42 = vmul.f32 %v519_v34, %v327_v61  ;;  %v521_v43 = vadd.f32 1.0, %v908_v37  ;;  %v910_v50 = vpop.eup %909  ;;  %921 = verf.f32 %v400_v46  ;;  %v765_v53 = vunpack.c.h.bf16 %v862_v41 }
  0x54   :  { %646 = vst [vmem:[#allocation8 + $0x20] sm:$0xff] %v582_v38  ;;  %v584_v47 = vmul.f32 %v520_v39, %v328_v0  ;;  %v912_v54 = vpop.eup %911  ;;  %v522_v55 = vadd.f32 1.0, %v910_v50  ;;  %v333_v57 = vmul.f32 0.5, %v1217_v3  ;;  %v401_v56 = vmul.f32 0.70710677, %v273_v45 }
  0x55   :  { %647 = vst [vmem:[#allocation8 + $0x28] sm:$0xff] %v583_v42  ;;  %v585_v51 = vmul.f32 %v521_v43, %v329_v6  ;;  %v274_v58 = vadd.f32 %v1190_v7, %v203_v48  ;;  %v914_v59 = vpop.eup %913  ;;  %v523_v60 = vadd.f32 1.0, %v912_v54  ;;  %v204_v61 = vmul.f32 %v761_v49, %v1188_v1 }
  0x56   :  { %648 = vst [vmem:[#allocation8 + $0x30] sm:$0xff] %v584_v47  ;;  %v205_v62 = vmul.f32 %v764_v52, %v1188_v1  ;;  %v206_v63 = vmul.f32 %v765_v53, %v1188_v1  ;;  %v586_v2 = vmul.f32 %v522_v55, %v1223_v12  ;;  %v524_v5 = vadd.f32 1.0, %v914_v59 }
  0x57   :  { %649 = vst [vmem:[#allocation8 + $0x38] sm:$0xff] %v585_v51  ;;  %v916_v0 = vpop.eup %915  ;;  %v334_v6 = vmul.f32 0.5, %v1220_v4  ;;  %923 = verf.f32 %v401_v56  ;;  %v587_v8 = vmul.f32 %v523_v60, %v331_v30  ;;  %v402_v10 = vmul.f32 0.70710677, %v274_v58 }
  0x58   :  { %v918_v3 = vpop.eup %917  ;;  %v525_v9 = vadd.f32 1.0, %v916_v0  ;;  %v275_v11 = vadd.f32 %v1190_v7, %v204_v61  ;;  %650 = vst [vmem:[#allocation8 + $0x40] sm:$0xff] %v586_v2  ;;  %v588_v13 = vmul.f32 %v524_v5, %v332_v44  ;;  %v276_v15 = vadd.f32 %v1190_v7, %v205_v62  ;;  %v867_v62 = vld [vmem:[#allocation2 + $0x70] sm:$0xff]  }
  0x59   :  { %v526_v14 = vadd.f32 1.0, %v918_v3  ;;  %v277_v16 = vadd.f32 %v1190_v7, %v206_v63  ;;  %651 = vst [vmem:[#allocation8 + $0x48] sm:$0xff] %v587_v8  ;;  %v335_v18 = vmul.f32 0.5, %v1228_v21  ;;  %925 = verf.f32 %v402_v10 }
  0x5a   :  { %v589_v12 = vmul.f32 %v525_v9, %v333_v57  ;;  %v403_v4 = vmul.f32 0.70710677, %v275_v11  ;;  %v920_v20 = vpop.eup %919  ;;  %652 = vst [vmem:[#allocation8 + $0x50] sm:$0xff] %v588_v13  ;;  %v336_v23 = vmul.f32 0.5, %v272_v36  ;;  %v337_v24 = vmul.f32 0.5, %v273_v45 }
  0x5b   :  { %v590_v22 = vmul.f32 %v526_v14, %v334_v6  ;;  %v404_v25 = vmul.f32 0.70710677, %v276_v15  ;;  %v527_v27 = vadd.f32 1.0, %v920_v20  ;;  %v405_v28 = vmul.f32 0.70710677, %v277_v16  ;;  %v868_v20 = vld [vmem:[#allocation2 + $0x78] sm:$0xff]  }
  0x5c   :  { %653 = vst [vmem:[#allocation8 + $0x58] sm:$0xff] %v589_v12  ;;  %927 = verf.f32 %v403_v4  ;;  %v768_v29 = vunpack.c.l.bf16 %v863_v17  ;;  %v769_v30 = vunpack.c.h.bf16 %v863_v17  ;;  %v772_v31 = vunpack.c.l.bf16 %v864_v19 }
  0x5d   :  { %654 = vst [vmem:[#allocation8 + $0x60] sm:$0xff] %v590_v22  ;;  %929 = verf.f32 %v404_v25  ;;  %v773_v21 = vunpack.c.h.bf16 %v864_v19  ;;  %v922_v32 = vpop.eup %921  ;;  %v591_v33 = vmul.f32 %v527_v27, %v335_v18  ;;  %v776_v35 = vunpack.c.l.bf16 %v865_v26 }
  0x5e   :  { %931 = verf.f32 %v405_v28  ;;  %v207_v34 = vmul.f32 %v768_v29, %v1188_v1  ;;  %v528_v36 = vadd.f32 1.0, %v922_v32  ;;  %v208_v37 = vmul.f32 %v769_v30, %v1188_v1  ;;  %v869_v32 = vld [vmem:[#allocation2 + $0x80] sm:$0xff]  }
  0x5f   :  { %v209_v38 = vmul.f32 %v772_v31, %v1188_v1  ;;  %v210_v39 = vmul.f32 %v773_v21, %v1188_v1  ;;  %655 = vst [vmem:[#allocation8 + $0x68] sm:$0xff] %v591_v33  ;;  %v338_v41 = vmul.f32 0.5, %v274_v58  ;;  %v211_v43 = vmul.f32 %v776_v35, %v1188_v1 }
  0x60   :  { %v278_v42 = vadd.f32 %v1190_v7, %v207_v34  ;;  %v777_v44 = vunpack.c.h.bf16 %v865_v26  ;;  %v592_v47 = vmul.f32 %v528_v36, %v336_v23  ;;  %v279_v45 = vadd.f32 %v1190_v7, %v208_v37 }
  0x61   :  { %v924_v46 = vpop.eup %923  ;;  %v280_v48 = vadd.f32 %v1190_v7, %v209_v38  ;;  %v281_v49 = vadd.f32 %v1190_v7, %v210_v39  ;;  %v282_v52 = vadd.f32 %v1190_v7, %v211_v43  ;;  %v780_v53 = vunpack.c.l.bf16 %v866_v40 }
  0x62   :  { %v529_v50 = vadd.f32 1.0, %v924_v46  ;;  %v406_v51 = vmul.f32 0.70710677, %v278_v42  ;;  %656 = vst [vmem:[#allocation8 + $0x70] sm:$0xff] %v592_v47  ;;  %v339_v54 = vmul.f32 0.5, %v275_v11  ;;  %v340_v55 = vmul.f32 0.5, %v276_v15 }
  0x63   :  { %v407_v57 = vmul.f32 0.70710677, %v279_v45  ;;  %v408_v56 = vmul.f32 0.70710677, %v280_v48  ;;  %v926_v58 = vpop.eup %925  ;;  %v341_v60 = vmul.f32 0.5, %v277_v16  ;;  %v342_v0 = vmul.f32 0.5, %v278_v42 }
  0x64   :  { %v593_v59 = vmul.f32 %v529_v50, %v337_v24  ;;  %933 = verf.f32 %v406_v51  ;;  %v409_v61 = vmul.f32 0.70710677, %v281_v49  ;;  %v530_v63 = vadd.f32 1.0, %v926_v58 }
  0x65   :  { %935 = verf.f32 %v407_v57  ;;  %v410_v2 = vmul.f32 0.70710677, %v282_v52  ;;  %v212_v6 = vmul.f32 %v777_v44, %v1188_v1  ;;  %v213_v3 = vmul.f32 %v780_v53, %v1188_v1 }
  0x66   :  { %v928_v5 = vpop.eup %927  ;;  %657 = vst [vmem:[#allocation8 + $0x78] sm:$0xff] %v593_v59  ;;  %937 = verf.f32 %v408_v56  ;;  %v781_v8 = vunpack.c.h.bf16 %v866_v40  ;;  %v594_v10 = vmul.f32 %v530_v63, %v338_v41  ;;  %v784_v13 = vunpack.c.l.bf16 %v867_v62  ;;  %v871_v63 = vld [vmem:[#allocation2 + $0x90] sm:$0xff]  }
  0x67   :  { %v930_v9 = vpop.eup %929  ;;  %v531_v11 = vadd.f32 1.0, %v928_v5  ;;  %939 = verf.f32 %v409_v61  ;;  %v283_v16 = vadd.f32 %v1190_v7, %v212_v6  ;;  %v284_v17 = vadd.f32 %v1190_v7, %v213_v3 }
  0x68   :  { %v932_v14 = vpop.eup %931  ;;  %v532_v15 = vadd.f32 1.0, %v930_v9  ;;  %941 = verf.f32 %v410_v2  ;;  %658 = vst [vmem:[#allocation8 + $0x80] sm:$0xff] %v594_v10  ;;  %v214_v4 = vmul.f32 %v781_v8, %v1188_v1  ;;  %v215_v19 = vmul.f32 %v784_v13, %v1188_v1 }
  0x69   :  { %v595_v12 = vmul.f32 %v531_v11, %v339_v54  ;;  %v533_v18 = vadd.f32 1.0, %v932_v14  ;;  %v343_v23 = vmul.f32 0.5, %v279_v45  ;;  %v344_v24 = vmul.f32 0.5, %v280_v48 }
  0x6a   :  { %v596_v22 = vmul.f32 %v532_v15, %v340_v55  ;;  %v411_v25 = vmul.f32 0.70710677, %v283_v16  ;;  %v412_v27 = vmul.f32 0.70710677, %v284_v17  ;;  %v285_v28 = vadd.f32 %v1190_v7, %v214_v4 }
  0x6b   :  { %659 = vst [vmem:[#allocation8 + $0x88] sm:$0xff] %v595_v12  ;;  %v597_v26 = vmul.f32 %v533_v18, %v341_v60  ;;  %v1265_v29 = vadd.f32 %v1190_v7, %v215_v19  ;;  %v785_v30 = vunpack.c.h.bf16 %v867_v62  ;;  %v788_v31 = vunpack.c.l.bf16 %v868_v20  ;;  %v870_v62 = vld [vmem:[#allocation2 + $0x88] sm:$0xff]  }
  0x6c   :  { %660 = vst [vmem:[#allocation8 + $0x90] sm:$0xff] %v596_v22  ;;  %943 = verf.f32 %v411_v25  ;;  %v789_v21 = vunpack.c.h.bf16 %v868_v20  ;;  %v345_v33 = vmul.f32 0.5, %v281_v49  ;;  %v346_v34 = vmul.f32 0.5, %v282_v52 }
  0x6d   :  { %661 = vst [vmem:[#allocation8 + $0x98] sm:$0xff] %v597_v26  ;;  %945 = verf.f32 %v412_v27  ;;  %v413_v35 = vmul.f32 0.70710677, %v285_v28  ;;  %v414_v37 = vmul.f32 0.70710677, %v1265_v29  ;;  %v216_v38 = vmul.f32 %v785_v30, %v1188_v1 }
  0x6e   :  { %v934_v36 = vpop.eup %933  ;;  %v217_v39 = vmul.f32 %v788_v31, %v1188_v1  ;;  %v218_v40 = vmul.f32 %v789_v21, %v1188_v1  ;;  %v792_v43 = vunpack.c.l.bf16 %v869_v32  ;;  %v793_v44 = vunpack.c.h.bf16 %v869_v32 }
  0x6f   :  { %v936_v41 = vpop.eup %935  ;;  %v534_v42 = vadd.f32 1.0, %v934_v36  ;;  %947 = verf.f32 %v413_v35  ;;  %v287_v45 = vadd.f32 %v1190_v7, %v216_v38  ;;  %v347_v60 = vmul.f32 0.5, %v283_v16  ;;  %v873_v38 = vld [vmem:[#allocation2 + $0xa0] sm:$0xff]  }
  0x70   :  { %v938_v46 = vpop.eup %937  ;;  %v535_v47 = vadd.f32 1.0, %v936_v41  ;;  %949 = verf.f32 %v414_v37  ;;  %v288_v48 = vadd.f32 %v1190_v7, %v217_v39  ;;  %v289_v52 = vadd.f32 %v1190_v7, %v218_v40 }
  0x71   :  { %v940_v49 = vpop.eup %939  ;;  %v598_v50 = vmul.f32 %v534_v42, %v342_v0  ;;  %v536_v51 = vadd.f32 1.0, %v938_v46  ;;  %v219_v53 = vmul.f32 %v792_v43, %v1188_v1  ;;  %v415_v56 = vmul.f32 0.70710677, %v287_v45 }
  0x72   :  { %v942_v54 = vpop.eup %941  ;;  %v599_v55 = vmul.f32 %v535_v47, %v343_v23  ;;  %v537_v57 = vadd.f32 1.0, %v940_v49  ;;  %v416_v61 = vmul.f32 0.70710677, %v288_v48  ;;  %v348_v5 = vmul.f32 0.5, %v284_v17 }
  0x73   :  { %662 = vst [vmem:[#allocation8 + $0xa0] sm:$0xff] %v598_v50  ;;  %v600_v58 = vmul.f32 %v536_v51, %v344_v24  ;;  %v538_v59 = vadd.f32 1.0, %v942_v54  ;;  %951 = verf.f32 %v415_v56  ;;  %v417_v0 = vmul.f32 0.70710677, %v289_v52 }
  0x74   :  { %663 = vst [vmem:[#allocation8 + $0xa8] sm:$0xff] %v599_v55  ;;  %v601_v2 = vmul.f32 %v537_v57, %v345_v33  ;;  %953 = verf.f32 %v416_v61  ;;  %v1276_v3 = vadd.f32 %v1190_v7, %v219_v53  ;;  %v220_v8 = vmul.f32 %v793_v44, %v1188_v1 }
  0x75   :  { %664 = vst [vmem:[#allocation8 + $0xb0] sm:$0xff] %v600_v58  ;;  %v602_v6 = vmul.f32 %v538_v59, %v346_v34  ;;  %955 = verf.f32 %v417_v0  ;;  %v796_v10 = vunpack.c.l.bf16 %v870_v62  ;;  %v797_v11 = vunpack.c.h.bf16 %v870_v62  ;;  %v872_v34 = vld [vmem:[#allocation2 + $0x98] sm:$0xff]  }
  0x76   :  { %v944_v9 = vpop.eup %943  ;;  %665 = vst [vmem:[#allocation8 + $0xb8] sm:$0xff] %v601_v2  ;;  %v800_v13 = vunpack.c.l.bf16 %v871_v63  ;;  %v349_v16 = vmul.f32 0.5, %v285_v28  ;;  %v418_v17 = vmul.f32 0.70710677, %v1276_v3  ;;  %v1281_v12 = vadd.f32 %v1190_v7, %v220_v8 }
  0x77   :  { %v946_v14 = vpop.eup %945  ;;  %666 = vst [vmem:[#allocation8 + $0xc0] sm:$0xff] %v602_v6  ;;  %v539_v15 = vadd.f32 1.0, %v944_v9  ;;  %v221_v4 = vmul.f32 %v796_v10, %v1188_v1  ;;  %v222_v19 = vmul.f32 %v797_v11, %v1188_v1  ;;  %v350_v24 = vmul.f32 0.5, %v1265_v29  ;;  %v874_v10 = vld [vmem:[#allocation2 + $0xa8] sm:$0xff]   ;;  %v875_v11 = vld [vmem:[#allocation2 + $0xb0] sm:$0xff]  }
  0x78   :  { %v540_v18 = vadd.f32 1.0, %v946_v14  ;;  %v223_v20 = vmul.f32 %v800_v13, %v1188_v1  ;;  %957 = verf.f32 %v418_v17  ;;  %v419_v25 = vmul.f32 0.70710677, %v1281_v12 }
  0x79   :  { %v948_v22 = vpop.eup %947  ;;  %v603_v23 = vmul.f32 %v539_v15, %v347_v60  ;;  %v292_v30 = vadd.f32 %v1190_v7, %v221_v4  ;;  %v293_v31 = vadd.f32 %v1190_v7, %v222_v19  ;;  %v801_v33 = vunpack.c.h.bf16 %v871_v63 }
  0x7a   :  { %v950_v26 = vpop.eup %949  ;;  %v604_v27 = vmul.f32 %v540_v18, %v348_v5  ;;  %v541_v28 = vadd.f32 1.0, %v948_v22  ;;  %959 = verf.f32 %v419_v25  ;;  %v1291_v32 = vadd.f32 %v1190_v7, %v223_v20 }
  0x7b   :  { %667 = vst [vmem:[#allocation8 + $0xc8] sm:$0xff] %v603_v23  ;;  %v542_v21 = vadd.f32 1.0, %v950_v26  ;;  %v351_v35 = vmul.f32 0.5, %v287_v45  ;;  %v352_v36 = vmul.f32 0.5, %v288_v48  ;;  %v420_v37 = vmul.f32 0.70710677, %v292_v30 }
  0x7c   :  { %668 = vst [vmem:[#allocation8 + $0xd0] sm:$0xff] %v604_v27  ;;  %v605_v29 = vmul.f32 %v541_v28, %v349_v16  ;;  %v353_v40 = vmul.f32 0.5, %v289_v52  ;;  %v421_v41 = vmul.f32 0.70710677, %v293_v31  ;;  %v422_v42 = vmul.f32 0.70710677, %v1291_v32 }
  0x7d   :  { %v606_v39 = vmul.f32 %v542_v21, %v350_v24  ;;  %v952_v43 = vpop.eup %951  ;;  %961 = verf.f32 %v420_v37  ;;  %v224_v44 = vmul.f32 %v801_v33, %v1188_v1  ;;  %v804_v46 = vunpack.c.l.bf16 %v872_v34  ;;  %v876_v23 = vld [vmem:[#allocation2 + $0xb8] sm:$0xff]  }
  0x7e   :  { %669 = vst [vmem:[#allocation8 + $0xd8] sm:$0xff] %v605_v29  ;;  %v805_v47 = vunpack.c.h.bf16 %v872_v34  ;;  %v954_v49 = vpop.eup %953  ;;  %v543_v50 = vadd.f32 1.0, %v952_v43  ;;  %963 = verf.f32 %v421_v41  ;;  %v808_v45 = vunpack.c.l.bf16 %v873_v38 }
  0x7f   :  { %670 = vst [vmem:[#allocation8 + $0xe0] sm:$0xff] %v606_v39  ;;  %v809_v48 = vunpack.c.h.bf16 %v873_v38  ;;  %v956_v51 = vpop.eup %955  ;;  %v544_v53 = vadd.f32 1.0, %v954_v49  ;;  %965 = verf.f32 %v422_v42  ;;  %v1296_v52 = vadd.f32 %v1190_v7, %v224_v44 }
  0x80   :  { %v225_v54 = vmul.f32 %v804_v46, %v1188_v1  ;;  %v607_v55 = vmul.f32 %v543_v50, %v351_v35  ;;  %v545_v57 = vadd.f32 1.0, %v956_v51  ;;  %v226_v56 = vmul.f32 %v805_v47, %v1188_v1  ;;  %v877_v50 = vld [vmem:[#allocation2 + $0xc0] sm:$0xff]  }
  0x81   :  { %v227_v58 = vmul.f32 %v808_v45, %v1188_v1  ;;  %v608_v59 = vmul.f32 %v544_v53, %v352_v36  ;;  %v354_v60 = vmul.f32 0.5, %v1276_v3  ;;  %v423_v61 = vmul.f32 0.70710677, %v1296_v52 }
  0x82   :  { %v296_v62 = vadd.f32 %v1190_v7, %v225_v54  ;;  %v958_v63 = vpop.eup %957  ;;  %671 = vst [vmem:[#allocation8 + $0xe8] sm:$0xff] %v607_v55  ;;  %v609_v2 = vmul.f32 %v545_v57, %v353_v40  ;;  %v297_v5 = vadd.f32 %v1190_v7, %v226_v56  ;;  %v228_v6 = vmul.f32 %v809_v48, %v1188_v1 }
  0x83   :  { %v1306_v0 = vadd.f32 %v1190_v7, %v227_v58  ;;  %672 = vst [vmem:[#allocation8 + $0xf0] sm:$0xff] %v608_v59  ;;  %v546_v8 = vadd.f32 1.0, %v958_v63  ;;  %v355_v9 = vmul.f32 0.5, %v1281_v12  ;;  %967 = verf.f32 %v423_v61 }
  0x84   :  { %v424_v3 = vmul.f32 0.70710677, %v296_v62  ;;  %v960_v13 = vpop.eup %959  ;;  %673 = vst [vmem:[#allocation8 + $0xf8] sm:$0xff] %v609_v2  ;;  %v356_v14 = vmul.f32 0.5, %v292_v30  ;;  %v357_v15 = vmul.f32 0.5, %v293_v31  ;;  %v299_v19 = vadd.f32 %v1190_v7, %v228_v6 }
  0x85   :  { %v425_v16 = vmul.f32 0.70710677, %v297_v5  ;;  %v426_v17 = vmul.f32 0.70710677, %v1306_v0  ;;  %v610_v18 = vmul.f32 %v546_v8, %v354_v60  ;;  %v547_v4 = vadd.f32 1.0, %v960_v13 }
  0x86   :  { %969 = verf.f32 %v424_v3  ;;  %v812_v20 = vunpack.c.l.bf16 %v874_v10  ;;  %v813_v22 = vunpack.c.h.bf16 %v874_v10  ;;  %v816_v12 = vunpack.c.l.bf16 %v875_v11 }
  0x87   :  { %971 = verf.f32 %v425_v16  ;;  %v962_v24 = vpop.eup %961  ;;  %674 = vst [vmem:[#allocation8 + $0x100] sm:$0xff] %v610_v18  ;;  %v611_v25 = vmul.f32 %v547_v4, %v355_v9  ;;  %v358_v26 = vmul.f32 0.5, %v1291_v32  ;;  %v427_v27 = vmul.f32 0.70710677, %v299_v19 }
  0x88   :  { %973 = verf.f32 %v426_v17  ;;  %v964_v28 = vpop.eup %963  ;;  %v548_v30 = vadd.f32 1.0, %v962_v24  ;;  %v229_v31 = vmul.f32 %v812_v20, %v1188_v1  ;;  %v230_v21 = vmul.f32 %v813_v22, %v1188_v1  ;;  %v879_v22 = vld [vmem:[#allocation2 + $0xd0] sm:$0xff]  }
  0x89   :  { %v231_v33 = vmul.f32 %v816_v12, %v1188_v1  ;;  %v966_v34 = vpop.eup %965  ;;  %675 = vst [vmem:[#allocation8 + $0x108] sm:$0xff] %v611_v25  ;;  %v549_v29 = vadd.f32 1.0, %v964_v28  ;;  %975 = verf.f32 %v427_v27  ;;  %v817_v35 = vunpack.c.h.bf16 %v875_v11 }
  0x8a   :  { %v820_v36 = vunpack.c.l.bf16 %v876_v23  ;;  %v612_v37 = vmul.f32 %v548_v30, %v356_v14  ;;  %v550_v38 = vadd.f32 1.0, %v966_v34  ;;  %v300_v32 = vadd.f32 %v1190_v7, %v229_v31 }
  0x8b   :  { %v301_v39 = vadd.f32 %v1190_v7, %v230_v21  ;;  %v613_v40 = vmul.f32 %v549_v29, %v357_v15  ;;  %v1319_v41 = vadd.f32 %v1190_v7, %v231_v33  ;;  %v232_v42 = vmul.f32 %v817_v35, %v1188_v1 }
  0x8c   :  { %v233_v43 = vmul.f32 %v820_v36, %v1188_v1  ;;  %676 = vst [vmem:[#allocation8 + $0x110] sm:$0xff] %v612_v37  ;;  %v614_v44 = vmul.f32 %v550_v38, %v358_v26  ;;  %v359_v46 = vmul.f32 0.5, %v1296_v52  ;;  %v360_v47 = vmul.f32 0.5, %v296_v62 }
  0x8d   :  { %v428_v49 = vmul.f32 0.70710677, %v300_v32  ;;  %v968_v45 = vpop.eup %967  ;;  %677 = vst [vmem:[#allocation8 + $0x118] sm:$0xff] %v613_v40  ;;  %v361_v48 = vmul.f32 0.5, %v297_v5  ;;  %v429_v51 = vmul.f32 0.70710677, %v301_v39  ;;  %v303_v54 = vadd.f32 %v1190_v7, %v232_v42 }
  0x8e   :  { %v430_v53 = vmul.f32 0.70710677, %v1319_v41  ;;  %678 = vst [vmem:[#allocation8 + $0x120] sm:$0xff] %v614_v44  ;;  %v551_v55 = vadd.f32 1.0, %v968_v45  ;;  %v1327_v57 = vadd.f32 %v1190_v7, %v233_v43  ;;  %v821_v56 = vunpack.c.h.bf16 %v876_v23  ;;  %v878_v5 = vld [vmem:[#allocation2 + $0xc8] sm:$0xff]  }
  0x8f   :  { %977 = verf.f32 %v428_v49  ;;  %v362_v52 = vmul.f32 0.5, %v1306_v0  ;;  %v431_v59 = vmul.f32 0.70710677, %v303_v54  ;;  %v824_v60 = vunpack.c.l.bf16 %v877_v50 }
  0x90   :  { %v970_v58 = vpop.eup %969  ;;  %979 = verf.f32 %v429_v51  ;;  %v615_v62 = vmul.f32 %v551_v55, %v359_v46  ;;  %v363_v2 = vmul.f32 0.5, %v299_v19  ;;  %v432_v9 = vmul.f32 0.70710677, %v1327_v57 }
  0x91   :  { %v972_v61 = vpop.eup %971  ;;  %v552_v63 = vadd.f32 1.0, %v970_v58  ;;  %981 = verf.f32 %v430_v53  ;;  %v234_v3 = vmul.f32 %v821_v56, %v1188_v1  ;;  %v235_v0 = vmul.f32 %v824_v60, %v1188_v1  ;;  %v1351_v58 = vld [vmem:[#allocation7] ss:$0 sm:$0xff] }
  0x92   :  { %v974_v6 = vpop.eup %973  ;;  %v553_v8 = vadd.f32 1.0, %v972_v61  ;;  %983 = verf.f32 %v431_v59  ;;  %679 = vst [vmem:[#allocation8 + $0x128] sm:$0xff] %v615_v62  ;;  %v825_v13 = vunpack.c.h.bf16 %v877_v50  ;;  %v828_v17 = vunpack.c.l.bf16 %v878_v5  ;;  %v881_v60 = vld [vmem:[#allocation2 + $0xe0] sm:$0xff]  }
  0x93   :  { %v616_v10 = vmul.f32 %v552_v63, %v360_v47  ;;  %v554_v11 = vadd.f32 1.0, %v974_v6  ;;  %v976_v14 = vpop.eup %975  ;;  %985 = verf.f32 %v432_v9  ;;  %v305_v16 = vadd.f32 %v1190_v7, %v234_v3  ;;  %v880_v47 = vld [vmem:[#allocation2 + $0xd8] sm:$0xff]  }
  0x94   :  { %v617_v15 = vmul.f32 %v553_v8, %v361_v48  ;;  %v555_v4 = vadd.f32 1.0, %v976_v14  ;;  %v306_v19 = vadd.f32 %v1190_v7, %v235_v0  ;;  %v236_v20 = vmul.f32 %v825_v13, %v1188_v1 }
  0x95   :  { %680 = vst [vmem:[#allocation8 + $0x130] sm:$0xff] %v616_v10  ;;  %v618_v18 = vmul.f32 %v554_v11, %v362_v52  ;;  %v364_v12 = vmul.f32 0.5, %v300_v32  ;;  %v433_v23 = vmul.f32 0.70710677, %v305_v16  ;;  %v237_v24 = vmul.f32 %v828_v17, %v1188_v1  ;;  %v882_v11 = vld [vmem:[#allocation2 + $0xe8] sm:$0xff]  }
  0x96   :  { %681 = vst [vmem:[#allocation8 + $0x138] sm:$0xff] %v617_v15  ;;  %v829_v25 = vunpack.c.h.bf16 %v878_v5  ;;  %v619_v26 = vmul.f32 %v555_v4, %v363_v2  ;;  %v365_v27 = vmul.f32 0.5, %v301_v39  ;;  %v434_v28 = vmul.f32 0.70710677, %v306_v19  ;;  %v1358_v5 = vld [vmem:[#allocation5] ss:$0 sm:$0xff] }
  0x97   :  { %682 = vst [vmem:[#allocation8 + $0x140] sm:$0xff] %v618_v18  ;;  %v307_v30 = vadd.f32 %v1190_v7, %v236_v20  ;;  %987 = verf.f32 %v433_v23  ;;  %v308_v31 = vadd.f32 %v1190_v7, %v237_v24  ;;  %v832_v33 = vunpack.c.l.bf16 %v879_v22 }
  0x98   :  { %v238_v21 = vmul.f32 %v829_v25, %v1188_v1  ;;  %683 = vst [vmem:[#allocation8 + $0x148] sm:$0xff] %v619_v26  ;;  %v366_v29 = vmul.f32 0.5, %v1319_v41  ;;  %989 = verf.f32 %v434_v28  ;;  %v833_v36 = vunpack.c.h.bf16 %v879_v22 }
  0x99   :  { %v978_v34 = vpop.eup %977  ;;  %v435_v35 = vmul.f32 0.70710677, %v307_v30  ;;  %v367_v32 = vmul.f32 0.5, %v303_v54  ;;  %v436_v39 = vmul.f32 0.70710677, %v308_v31  ;;  %v239_v44 = vmul.f32 %v832_v33, %v1188_v1  ;;  %v883_v33 = vld [vmem:[#allocation2 + $0xf0] sm:$0xff]  }
  0x9a   :  { %v980_v37 = vpop.eup %979  ;;  %v556_v38 = vadd.f32 1.0, %v978_v34  ;;  %v1342_v40 = vadd.f32 %v1190_v7, %v238_v21  ;;  %v240_v46 = vmul.f32 %v833_v36, %v1188_v1  ;;  %v368_v45 = vmul.f32 0.5, %v1327_v57 }
  0x9b   :  { %v982_v42 = vpop.eup %981  ;;  %v557_v43 = vadd.f32 1.0, %v980_v37  ;;  %991 = verf.f32 %v435_v35  ;;  %v1349_v54 = vadd.f32 %v1190_v7, %v239_v44  ;;  %v836_v52 = vunpack.c.l.bf16 %v880_v47 }
  0x9c   :  { %v984_v49 = vpop.eup %983  ;;  %v620_v41 = vmul.f32 %v556_v38, %v364_v12  ;;  %v558_v50 = vadd.f32 1.0, %v982_v42  ;;  %993 = verf.f32 %v436_v39  ;;  %v437_v53 = vmul.f32 0.70710677, %v1342_v40 }
  0x9d   :  { %v621_v48 = vmul.f32 %v557_v43, %v365_v27  ;;  %v559_v51 = vadd.f32 1.0, %v984_v49  ;;  %v986_v55 = vpop.eup %985  ;;  %v1354_v1 = vadd.f32 %v1351_v58, %v240_v46  ;;  %v837_v59 = vunpack.c.h.bf16 %v880_v47 }
  0x9e   :  { %684 = vst [vmem:[#allocation8 + $0x150] sm:$0xff] %v620_v41  ;;  %v622_v56 = vmul.f32 %v558_v50, %v366_v29  ;;  %v560_v61 = vadd.f32 1.0, %v986_v55  ;;  %v369_v62 = vmul.f32 0.5, %v305_v16  ;;  %995 = verf.f32 %v437_v53 }
  0x9f   :  { %685 = vst [vmem:[#allocation8 + $0x158] sm:$0xff] %v621_v48  ;;  %v623_v57 = vmul.f32 %v559_v51, %v367_v32  ;;  %v370_v63 = vmul.f32 0.5, %v306_v19  ;;  %v438_v7 = vmul.f32 0.70710677, %v1349_v54  ;;  %v439_v2 = vmul.f32 0.70710677, %v1354_v1 }
  0xa0   :  { %686 = vst [vmem:[#allocation8 + $0x160] sm:$0xff] %v622_v56  ;;  %v241_v6 = vmul.f32 %v1358_v5, %v836_v52  ;;  %v624_v8 = vmul.f32 %v560_v61, %v368_v45  ;;  %v242_v9 = vmul.f32 %v1358_v5, %v837_v59  ;;  %v840_v3 = vunpack.c.l.bf16 %v881_v60  ;;  %v884_v32 = vld [vmem:[#allocation2 + $0xf8] sm:$0xff]  }
  0xa1   :  { %687 = vst [vmem:[#allocation8 + $0x168] sm:$0xff] %v623_v57  ;;  %v841_v10 = vunpack.c.h.bf16 %v881_v60  ;;  %v988_v0 = vpop.eup %987  ;;  %v371_v13 = vmul.f32 0.5, %v307_v30  ;;  %v372_v14 = vmul.f32 0.5, %v308_v31  ;;  %997 = verf.f32 %v438_v7 }
  0xa2   :  { %v1363_v15 = vadd.f32 %v1351_v58, %v241_v6  ;;  %v990_v16 = vpop.eup %989  ;;  %688 = vst [vmem:[#allocation8 + $0x170] sm:$0xff] %v624_v8  ;;  %v561_v17 = vadd.f32 1.0, %v988_v0  ;;  %999 = verf.f32 %v439_v2  ;;  %v1366_v18 = vadd.f32 %v1351_v58, %v242_v9 }
  0xa3   :  { %v243_v4 = vmul.f32 %v1358_v5, %v840_v3  ;;  %v562_v19 = vadd.f32 1.0, %v990_v16  ;;  %v244_v22 = vmul.f32 %v1358_v5, %v841_v10  ;;  %v844_v12 = vunpack.c.l.bf16 %v882_v11 }
  0xa4   :  { %v440_v20 = vmul.f32 0.70710677, %v1363_v15  ;;  %v625_v24 = vmul.f32 %v561_v17, %v369_v62  ;;  %v441_v25 = vmul.f32 0.70710677, %v1366_v18  ;;  %v845_v27 = vunpack.c.h.bf16 %v882_v11 }
  0xa5   :  { %v992_v23 = vpop.eup %991  ;;  %v1373_v26 = vadd.f32 %v1351_v58, %v243_v4  ;;  %v626_v30 = vmul.f32 %v562_v19, %v370_v63  ;;  %v1376_v21 = vadd.f32 %v1351_v58, %v244_v22  ;;  %v373_v36 = vmul.f32 0.5, %v1342_v40 }
  0xa6   :  { %v994_v28 = vpop.eup %993  ;;  %v563_v31 = vadd.f32 1.0, %v992_v23  ;;  %1001 = verf.f32 %v440_v20  ;;  %689 = vst [vmem:[#allocation8 + $0x178] sm:$0xff] %v625_v24  ;;  %v245_v38 = vmul.f32 %v1358_v5, %v844_v12  ;;  %v246_v43 = vmul.f32 %v1358_v5, %v845_v27 }
  0xa7   :  { %v564_v34 = vadd.f32 1.0, %v994_v28  ;;  %1003 = verf.f32 %v441_v25  ;;  %v442_v29 = vmul.f32 0.70710677, %v1373_v26  ;;  %690 = vst [vmem:[#allocation8 + $0x180] sm:$0xff] %v626_v30  ;;  %v443_v37 = vmul.f32 0.70710677, %v1376_v21 }
  0xa8   :  { %v627_v35 = vmul.f32 %v563_v31, %v371_v13  ;;  %v996_v39 = vpop.eup %995  ;;  %v848_v44 = vunpack.c.l.bf16 %v883_v33  ;;  %v316_v47 = vadd.f32 %v1351_v58, %v245_v38  ;;  %v849_v49 = vunpack.c.h.bf16 %v883_v33 }
  0xa9   :  { %v628_v42 = vmul.f32 %v564_v34, %v372_v14  ;;  %1005 = verf.f32 %v442_v29  ;;  %v565_v46 = vadd.f32 1.0, %v996_v39  ;;  %v374_v40 = vmul.f32 0.5, %v1349_v54 }
  0xaa   :  { %691 = vst [vmem:[#allocation8 + $0x188] sm:$0xff] %v627_v35  ;;  %1007 = verf.f32 %v443_v37  ;;  %v317_v41 = vadd.f32 %v1351_v58, %v246_v43  ;;  %v247_v50 = vmul.f32 %v1358_v5, %v848_v44  ;;  %v852_v45 = vunpack.c.l.bf16 %v884_v32 }
  0xab   :  { %692 = vst [vmem:[#allocation8 + $0x190] sm:$0xff] %v628_v42  ;;  %v998_v48 = vpop.eup %997  ;;  %v629_v51 = vmul.f32 %v565_v46, %v373_v36  ;;  %v375_v53 = vmul.f32 0.5, %v1354_v1  ;;  %v444_v55 = vmul.f32 0.70710677, %v316_v47  ;;  %v248_v56 = vmul.f32 %v1358_v5, %v849_v49 }
  0xac   :  { %v1000_v52 = vpop.eup %999  ;;  %v566_v59 = vadd.f32 1.0, %v998_v48  ;;  %v445_v60 = vmul.f32 0.70710677, %v317_v41  ;;  %v318_v57 = vadd.f32 %v1351_v58, %v247_v50  ;;  %v853_v61 = vunpack.c.h.bf16 %v884_v32 }
  0xad   :  { %693 = vst [vmem:[#allocation8 + $0x198] sm:$0xff] %v629_v51  ;;  %v567_v54 = vadd.f32 1.0, %v1000_v52  ;;  %1009 = verf.f32 %v444_v55  ;;  %v319_v62 = vadd.f32 %v1351_v58, %v248_v56  ;;  %v249_v63 = vmul.f32 %v1358_v5, %v852_v45 }
  0xae   :  { %v630_v7 = vmul.f32 %v566_v59, %v374_v40  ;;  %v376_v2 = vmul.f32 0.5, %v1363_v15  ;;  %1011 = verf.f32 %v445_v60  ;;  %v446_v1 = vmul.f32 0.70710677, %v318_v57 }
  0xaf   :  { %v631_v8 = vmul.f32 %v567_v54, %v375_v53  ;;  %v377_v9 = vmul.f32 0.5, %v1366_v18  ;;  %v447_v3 = vmul.f32 0.70710677, %v319_v62  ;;  %v320_v10 = vadd.f32 %v1351_v58, %v249_v63 }
  0xb0   :  { %v1002_v6 = vpop.eup %1001  ;;  %694 = vst [vmem:[#allocation8 + $0x1a0] sm:$0xff] %v630_v7  ;;  %1013 = verf.f32 %v446_v1  ;;  %v250_v13 = vmul.f32 %v1358_v5, %v853_v61  ;;  %v378_v16 = vmul.f32 0.5, %v1373_v26  ;;  %v379_v19 = vmul.f32 0.5, %v1376_v21 }
  0xb1   :  { %v1004_v11 = vpop.eup %1003  ;;  %v568_v0 = vadd.f32 1.0, %v1002_v6  ;;  %695 = vst [vmem:[#allocation8 + $0x1a8] sm:$0xff] %v631_v8  ;;  %1015 = verf.f32 %v447_v3  ;;  %v448_v15 = vmul.f32 0.70710677, %v320_v10  ;;  %v380_v27 = vmul.f32 0.5, %v316_v47 }
  0xb2   :  { %v569_v14 = vadd.f32 1.0, %v1004_v11  ;;  %v321_v18 = vadd.f32 %v1351_v58, %v250_v13  ;;  %v381_v28 = vmul.f32 0.5, %v317_v41  ;;  %v382_v58 = vmul.f32 0.5, %v318_v57 }
  0xb3   :  { %v1006_v17 = vpop.eup %1005  ;;  %v632_v4 = vmul.f32 %v568_v0, %v376_v2  ;;  %1017 = verf.f32 %v448_v15  ;;  %v383_v29 = vmul.f32 0.5, %v319_v62  ;;  %v384_v32 = vmul.f32 0.5, %v320_v10 }
  0xb4   :  { %v1008_v20 = vpop.eup %1007  ;;  %v633_v22 = vmul.f32 %v569_v14, %v377_v9  ;;  %v570_v12 = vadd.f32 1.0, %v1006_v17  ;;  %v449_v24 = vmul.f32 0.70710677, %v321_v18  ;;  %v385_v46 = vmul.f32 0.5, %v321_v18 }
  0xb5   :  { %696 = vst [vmem:[#allocation8 + $0x1b0] sm:$0xff] %v632_v4  ;;  %v571_v23 = vadd.f32 1.0, %v1008_v20 }
  0xb6   :  { %697 = vst [vmem:[#allocation8 + $0x1b8] sm:$0xff] %v633_v22  ;;  %v634_v5 = vmul.f32 %v570_v12, %v378_v16  ;;  %1019 = verf.f32 %v449_v24 }
  0xb7   :  { %v635_v25 = vmul.f32 %v571_v23, %v379_v19  ;;  %v1010_v26 = vpop.eup %1009 }
  0xb8   :  { %698 = vst [vmem:[#allocation8 + $0x1c0] sm:$0xff] %v634_v5  ;;  %v1012_v30 = vpop.eup %1011  ;;  %v572_v31 = vadd.f32 1.0, %v1010_v26 }
  0xb9   :  { %699 = vst [vmem:[#allocation8 + $0x1c8] sm:$0xff] %v635_v25  ;;  %v573_v21 = vadd.f32 1.0, %v1012_v30 }
  0xba   :  { %v1014_v33 = vpop.eup %1013  ;;  %v636_v34 = vmul.f32 %v572_v31, %v380_v27 }
  0xbb   :  { %v1016_v35 = vpop.eup %1015  ;;  %v637_v36 = vmul.f32 %v573_v21, %v381_v28  ;;  %v574_v37 = vadd.f32 1.0, %v1014_v33 }
  0xbc   :  { %700 = vst [vmem:[#allocation8 + $0x1d0] sm:$0xff] %v636_v34  ;;  %v575_v38 = vadd.f32 1.0, %v1016_v35 }
  0xbd   :  { %v1018_v39 = vpop.eup %1017  ;;  %701 = vst [vmem:[#allocation8 + $0x1d8] sm:$0xff] %v637_v36  ;;  %v638_v42 = vmul.f32 %v574_v37, %v382_v58 }
  0xbe   :  { %v639_v43 = vmul.f32 %v575_v38, %v383_v29  ;;  %v576_v44 = vadd.f32 1.0, %v1018_v39 }
  0xbf   :  { %702 = vst [vmem:[#allocation8 + $0x1e0] sm:$0xff] %v638_v42 }
  0xc0   :  { %v1020_v47 = vpop.eup %1019  ;;  %703 = vst [vmem:[#allocation8 + $0x1e8] sm:$0xff] %v639_v43  ;;  %v640_v49 = vmul.f32 %v576_v44, %v384_v32 }
  0xc1   :  { %v577_v40 = vadd.f32 1.0, %v1020_v47 }
  0xc2   :  { %704 = vst [vmem:[#allocation8 + $0x1f0] sm:$0xff] %v640_v49 }
  0xc3   :  { %v641_v41 = vmul.f32 %v577_v40, %v385_v46 }
  0xc5   :  { %705 = vst [vmem:[#allocation8 + $0x1f8] sm:$0xff] %v641_v41 }
  0xc6   :  { %1100 = shalt.err (!%p1097_p0)
}
  0xc7   :  { %s1101_s27 = scalar_lea.hbm %s1414_s3, 8192 }
  0xc8   :  { %p1102_p1 = scmp.ne.s32.totalorder %s1414_s3, %s1101_s27  ;;  %p1105_p2 = scmp.lt.u32.totalorder %s1101_s27, %s1414_s3 }
  0xca   :  { %p1107_p3 = pnand %p1105_p2, %p1102_p1 }
  0xcc   :  { %1110 = shalt.err (!%p1107_p3)
}
  0xcd   :  { %s1123_s5 = smov 128   ;;  %s1124_s6 = smov 8  }
  0xce   :  { %717 = dma.vmem_to_hbm [thread:$0]  %s712_s23, 8192, %s1414_s3, [#allocation4], %s1123_s5, %s1123_s5, %s1124_s6  }
  0xcf   :  { %1115 = dma.done.wait [#allocation4], 8192  }
  0xd0   :  { %1116 = vsyncadd [#allocation4], 4294959104 }
  0xd1   :  { %721 = vsyncpa [#allocation3], 1 }
  0xd2   :  { %722 = vsyncpa [#allocation6], 1 }
  0xd3   :  { %723 = vsyncpa [#allocation4], 1 }

// kernel: conv_norm_act.2
= control target key start
LH: loop header
LB: loop body
LE: loop exit
PB: predicated region body
PF: predicated region fallthrough
CT: control target
= control target key end

     0   :  { %9 = vsyncpa [#allocation3], 0  ;;  %s2074_s0 = inlined_call_operand.hbm [shape: bf16[512,128], index: 0, kind: input, shape index: {}]   ;;  %s2075_s1 = inlined_call_operand.hbm [shape: bf16[128,128], index: 1, kind: input, shape index: {}]   ;;  %s2076_s2 = inlined_call_operand.hbm [shape: bf16[512,128], index: 2, kind: output, shape index: {0}]   ;;  %s2077_s3 = inlined_call_operand.hbm [shape: f32[1,2,128], index: 3, kind: output, shape index: {1}]  }
   0x1   :  { %10 = vsyncpa [#allocation6], 0 }
   0x2   :  { %11 = vsyncpa [#allocation4], 0 }
   0x3   :  { %12 = vsyncpa [#allocation9], 0  ;;  %s1911_s12 = smov [#allocation2]   ;;  %s1815_s16 = scalar_lea.hbm %s2074_s0, 4096 }
   0x4   :  { %s18_s13 = sshll.u32 %s1911_s12, 4  ;;  %p1816_p0 = scmp.ne.s32.totalorder %s2074_s0, %s1815_s16  ;;  %s19_s13 = int_to_ptr.vmem [resolvable:$true] %s18_s13 }
   0x5   :  { %p1819_p1 = scmp.lt.u32.totalorder %s1815_s16, %s2074_s0 }
   0x7   :  { %p1821_p2 = pnand %p1819_p1, %p1816_p0 }
   0x9   :  { %1824 = shalt.err (!%p1821_p2)
}
   0xa   :  { %s1825_s21 = scalar_lea.vmem %s19_s13, 4096  ;;  %p1830_p4 = scmp.lt.s32.totalorder %s19_s13, %s19_s13 }
   0xb   :  { %p1826_p3 = scmp.ne.s32.totalorder %s19_s13, %s1825_s21  ;;  %p1831_p5 = scmp.lt.s32.totalorder %s1825_s21, %s1825_s21 }
   0xd   :  { %p1832_p6 = por %p1831_p5, %p1830_p4 }
   0xf   :  { %p1833_p7 = pnand %p1832_p6, %p1826_p3 }
  0x11   :  { %1836 = shalt.err (!%p1833_p7)
}
  0x12   :  { %s1912_s22 = smov 64   ;;  %s1913_s23 = smov 4  }
  0x13   :  { %24 = dma.hbm_to_vmem [thread:$0]  %s2074_s0, 4096, %s19_s13, [#allocation3], %s1912_s22, %s1912_s22, %s1913_s23  }
  0x14   :  { %s1914_s26 = smov [#allocation5]   ;;  %s1837_s30 = scalar_lea.hbm %s2075_s1, 1024 }
  0x15   :  { %s30_s27 = sshll.u32 %s1914_s26, 4  ;;  %p1838_p8 = scmp.ne.s32.totalorder %s2075_s1, %s1837_s30  ;;  %s31_s27 = int_to_ptr.vmem [resolvable:$true] %s30_s27 }
  0x16   :  { %p1841_p9 = scmp.lt.u32.totalorder %s1837_s30, %s2075_s1 }
  0x18   :  { %p1843_p10 = pnand %p1841_p9, %p1838_p8 }
  0x1a   :  { %1846 = shalt.err (!%p1843_p10)
}
  0x1b   :  { %s1847_s8 = scalar_lea.vmem %s31_s27, 1024  ;;  %p1852_p12 = scmp.lt.s32.totalorder %s31_s27, %s31_s27 }
  0x1c   :  { %p1848_p11 = scmp.ne.s32.totalorder %s31_s27, %s1847_s8  ;;  %p1853_p13 = scmp.lt.s32.totalorder %s1847_s8, %s1847_s8 }
  0x1e   :  { %p1854_p0 = por %p1853_p13, %p1852_p12 }
  0x20   :  { %p1855_p1 = pnand %p1854_p0, %p1848_p11 }
  0x22   :  { %1858 = shalt.err (!%p1855_p1)
}
  0x23   :  { %36 = dma.hbm_to_vmem [thread:$0]  %s2075_s1, 1024, %s31_s27, [#allocation6], %s1912_s22, %s1912_s22, %s1913_s23  }
  0x24   :  { %1903 = dma.done.wait [#allocation3], 4096  }
  0x25   :  { %1904 = vsyncadd [#allocation3], 4294963200 }
  0x26   :  { %1905 = dma.done.wait [#allocation6], 1024  }
  0x27   :  { %1906 = vsyncadd [#allocation6], 4294966272  ;;  %v1775_v0 = vld [vmem:[#allocation5] sm:$0xff]   ;;  %v1776_v1 = vld [vmem:[#allocation5 + $0x8] sm:$0xff]   ;;  %s1915_s1 = smov [#allocation7]  }
  0x28   :  { %1673 = vmatprep.subr.bf16.mxu0 %v1775_v0  ;;  %1753 = vmatprep.subr.bf16.mxu1 %v1775_v0  ;;  %v1777_v2 = vld [vmem:[#allocation5 + $0x10] sm:$0xff]   ;;  %v1778_v3 = vld [vmem:[#allocation5 + $0x18] sm:$0xff]   ;;  %v1783_v4 = vld [vmem:[#allocation2] sm:$0xff]   ;;  %s1247_s10 = sshll.u32 %s1915_s1, 4  ;;  %s1248_s10 = int_to_ptr.vmem [resolvable:$true] %s1247_s10 }
  0x29   :  { %1674 = vmatpush3.bf16.msra.mxu0 %v1775_v0  ;;  %1761 = vmatpush3.bf16.msra.mxu1 %v1775_v0  ;;  %v1779_v5 = vld [vmem:[#allocation5 + $0x20] sm:$0xff]   ;;  %v1780_v6 = vld [vmem:[#allocation5 + $0x28] sm:$0xff]   ;;  %v1781_v7 = vld [vmem:[#allocation5 + $0x30] sm:$0xff]   ;;  %s1859_s11 = scalar_lea.vmem %s1248_s10, 4096  ;;  %p1864_p3 = scmp.lt.s32.totalorder %s1248_s10, %s1248_s10 }
  0x2a   :  { %1675 = vmatprep.subr.bf16.mxu0 %v1776_v1  ;;  %1754 = vmatprep.subr.bf16.mxu1 %v1776_v1  ;;  %v1782_v8 = vld [vmem:[#allocation5 + $0x38] sm:$0xff]   ;;  %v1799_v9 = vld [vmem:[#allocation2 + $0x80] sm:$0xff]   ;;  %v1784_v10 = vld [vmem:[#allocation2 + $0x8] sm:$0xff]   ;;  %p1860_p2 = scmp.ne.s32.totalorder %s1248_s10, %s1859_s11  ;;  %p1865_p4 = scmp.lt.s32.totalorder %s1859_s11, %s1859_s11 }
  0x2b   :  { %1689 = vmatprep.mubr.bf16.mxu0 %v1783_v4  ;;  %1721 = vmatprep.mubr.bf16.mxu1 %v1799_v9  ;;  %v1785_v11 = vld [vmem:[#allocation2 + $0x10] sm:$0xff]   ;;  %v1800_v12 = vld [vmem:[#allocation2 + $0x88] sm:$0xff]   ;;  %v1786_v14 = vld [vmem:[#allocation2 + $0x18] sm:$0xff]  }
  0x2c   :  { %v1801_v13 = vld [vmem:[#allocation2 + $0x90] sm:$0xff]   ;;  %v1787_v15 = vld [vmem:[#allocation2 + $0x20] sm:$0xff]   ;;  %v1802_v16 = vld [vmem:[#allocation2 + $0x98] sm:$0xff]   ;;  %p1866_p5 = por %p1865_p4, %p1864_p3 }
  0x2d   :  { %1676 = vmatpush3.bf16.msra.mxu0 %v1776_v1  ;;  %1762 = vmatpush3.bf16.msra.mxu1 %v1776_v1  ;;  %v1803_v17 = vld [vmem:[#allocation2 + $0xa0] sm:$0xff]   ;;  %v1788_v18 = vld [vmem:[#allocation2 + $0x28] sm:$0xff]   ;;  %v1789_v20 = vld [vmem:[#allocation2 + $0x30] sm:$0xff]  }
  0x2e   :  { %1677 = vmatprep.subr.bf16.mxu0 %v1777_v2  ;;  %1755 = vmatprep.subr.bf16.mxu1 %v1777_v2  ;;  %v1804_v19 = vld [vmem:[#allocation2 + $0xa8] sm:$0xff]   ;;  %v1805_v21 = vld [vmem:[#allocation2 + $0xb0] sm:$0xff]   ;;  %v1790_v22 = vld [vmem:[#allocation2 + $0x38] sm:$0xff]   ;;  %p1867_p6 = pnand %p1866_p5, %p1860_p2 }
  0x2f   :  { %v1806_v23 = vld [vmem:[#allocation2 + $0xb8] sm:$0xff]   ;;  %v1791_v24 = vld [vmem:[#allocation2 + $0x40] sm:$0xff]   ;;  %v1792_v26 = vld [vmem:[#allocation2 + $0x48] sm:$0xff]  }
  0x30   :  { %v1807_v25 = vld [vmem:[#allocation2 + $0xc0] sm:$0xff]   ;;  %v1808_v27 = vld [vmem:[#allocation2 + $0xc8] sm:$0xff]   ;;  %v1793_v28 = vld [vmem:[#allocation2 + $0x50] sm:$0xff]  }
  0x31   :  { %1678 = vmatpush3.bf16.msra.mxu0 %v1777_v2  ;;  %1763 = vmatpush3.bf16.msra.mxu1 %v1777_v2  ;;  %v1809_v29 = vld [vmem:[#allocation2 + $0xd0] sm:$0xff]   ;;  %v1794_v30 = vld [vmem:[#allocation2 + $0x58] sm:$0xff]   ;;  %v1795_v32 = vld [vmem:[#allocation2 + $0x60] sm:$0xff]  }
  0x32   :  { %1679 = vmatprep.subr.bf16.mxu0 %v1778_v3  ;;  %1756 = vmatprep.subr.bf16.mxu1 %v1778_v3  ;;  %v1810_v31 = vld [vmem:[#allocation2 + $0xd8] sm:$0xff]   ;;  %v1811_v33 = vld [vmem:[#allocation2 + $0xe0] sm:$0xff]   ;;  %v1796_v34 = vld [vmem:[#allocation2 + $0x68] sm:$0xff]  }
  0x33   :  { %v1812_v35 = vld [vmem:[#allocation2 + $0xe8] sm:$0xff]   ;;  %v1797_v36 = vld [vmem:[#allocation2 + $0x70] sm:$0xff]   ;;  %v1798_v38 = vld [vmem:[#allocation2 + $0x78] sm:$0xff]  }
  0x34   :  { %v1813_v37 = vld [vmem:[#allocation2 + $0xf0] sm:$0xff]   ;;  %v1814_v39 = vld [vmem:[#allocation2 + $0xf8] sm:$0xff]  }
  0x35   :  { %1680 = vmatpush3.bf16.msra.mxu0 %v1778_v3  ;;  %1764 = vmatpush3.bf16.msra.mxu1 %v1778_v3 }
  0x36   :  { %1681 = vmatprep.subr.bf16.mxu0 %v1779_v5  ;;  %1757 = vmatprep.subr.bf16.mxu1 %v1779_v5 }
  0x39   :  { %1682 = vmatpush3.bf16.msra.mxu0 %v1779_v5  ;;  %1765 = vmatpush3.bf16.msra.mxu1 %v1779_v5 }
  0x3a   :  { %1683 = vmatprep.subr.bf16.mxu0 %v1780_v6  ;;  %1758 = vmatprep.subr.bf16.mxu1 %v1780_v6 }
  0x3d   :  { %1684 = vmatpush3.bf16.msra.mxu0 %v1780_v6  ;;  %1766 = vmatpush3.bf16.msra.mxu1 %v1780_v6 }
  0x3e   :  { %1685 = vmatprep.subr.bf16.mxu0 %v1781_v7  ;;  %1759 = vmatprep.subr.bf16.mxu1 %v1781_v7 }
  0x41   :  { %1686 = vmatpush3.bf16.msra.mxu0 %v1781_v7  ;;  %1767 = vmatpush3.bf16.msra.mxu1 %v1781_v7 }
  0x42   :  { %1687 = vmatprep.subr.bf16.mxu0 %v1782_v8  ;;  %1760 = vmatprep.subr.bf16.mxu1 %v1782_v8 }
  0x45   :  { %1688 = vmatpush3.bf16.msra.mxu0 %v1782_v8  ;;  %1768 = vmatpush3.bf16.msra.mxu1 %v1782_v8 }
  0x48   :  { %1690 = vmatmul.mubr.bf16.vlgmr.msra.gmra.mrb[0].mxu0 %v1784_v10  ;;  %1722 = vmatmul.mubr.bf16.vlgmr.msra.gmra.mrb[0].mxu1 %v1800_v12 }
  0x49   :  { %1693 = vmatprep.mubr.bf16.mxu0 %v1785_v11  ;;  %1725 = vmatprep.mubr.bf16.mxu1 %v1801_v13 }
  0x50   :  { %1694 = vmatmul.mubr.bf16.gmra.mrb[4].mxu0 %v1786_v14  ;;  %1726 = vmatmul.mubr.bf16.gmra.mrb[4].mxu1 %v1802_v16 }
  0x51   :  { %1697 = vmatprep.mubr.bf16.mxu0 %v1787_v15  ;;  %1729 = vmatprep.mubr.bf16.mxu1 %v1803_v17 }
  0x58   :  { %1698 = vmatmul.mubr.bf16.gmra.mrb[8].mxu0 %v1788_v18  ;;  %1730 = vmatmul.mubr.bf16.gmra.mrb[8].mxu1 %v1804_v19 }
  0x59   :  { %1701 = vmatprep.mubr.bf16.mxu0 %v1789_v20  ;;  %1733 = vmatprep.mubr.bf16.mxu1 %v1805_v21 }
  0x60   :  { %1702 = vmatmul.mubr.bf16.gmra.mrb[12].mxu0 %v1790_v22  ;;  %1734 = vmatmul.mubr.bf16.gmra.mrb[12].mxu1 %v1806_v23 }
  0x61   :  { %1705 = vmatprep.mubr.bf16.mxu0 %v1791_v24  ;;  %1737 = vmatprep.mubr.bf16.mxu1 %v1807_v25 }
  0x68   :  { %1706 = vmatmul.mubr.bf16.gmra.mrb[16].mxu0 %v1792_v26  ;;  %1738 = vmatmul.mubr.bf16.gmra.mrb[16].mxu1 %v1808_v27 }
  0x69   :  { %1709 = vmatprep.mubr.bf16.mxu0 %v1793_v28  ;;  %1741 = vmatprep.mubr.bf16.mxu1 %v1809_v29 }
  0x70   :  { %1710 = vmatmul.mubr.bf16.gmra.mrb[20].mxu0 %v1794_v30  ;;  %1742 = vmatmul.mubr.bf16.gmra.mrb[20].mxu1 %v1810_v31 }
  0x71   :  { %1713 = vmatprep.mubr.bf16.mxu0 %v1795_v32  ;;  %1745 = vmatprep.mubr.bf16.mxu1 %v1811_v33 }
  0x78   :  { %1714 = vmatmul.mubr.bf16.gmra.mrb[24].mxu0 %v1796_v34  ;;  %1746 = vmatmul.mubr.bf16.gmra.mrb[24].mxu1 %v1812_v35 }
  0x79   :  { %1717 = vmatprep.mubr.bf16.mxu0 %v1797_v36  ;;  %1749 = vmatprep.mubr.bf16.mxu1 %v1813_v37 }
  0x80   :  { %1718 = vmatmul.mubr.bf16.gmra.mrb[28].mxu0 %v1798_v38  ;;  %1750 = vmatmul.mubr.bf16.gmra.mrb[28].mxu1 %v1814_v39 }
 0x11b   :  { %v1691_v40 = vpop.f32.mrb[0].mxu0  ;;  %v1723_v41 = vpop.f32.mrb[0].mxu1 }
 0x11c   :  { %v398_v42 = vpop.f32.mrb[1].mxu0  ;;  %v526_v43 = vpop.f32.mrb[1].mxu1 }
 0x11d   :  { %v1692_v44 = vpop.f32.mrb[2].mxu0  ;;  %v1724_v45 = vpop.f32.mrb[2].mxu1 }
 0x11e   :  { %v654_v46 = vpack.c.bf16 %v1692_v44, %v1691_v40  ;;  %v401_v47 = vpop.f32.mrb[3].mxu0  ;;  %v1967_v48 = vpack.c.bf16 %v1724_v45, %v1723_v41  ;;  %v529_v49 = vpop.f32.mrb[3].mxu1 }
 0x11f   :  { %v653_v50 = vpack.c.bf16 %v401_v47, %v398_v42  ;;  %v1969_v51 = vpack.c.bf16 %v529_v49, %v526_v43 }
 0x120   :  { %1602 = vst [vmem:[#allocation7 + $0x8] sm:$0xff] %v654_v46   ;;  %1618 = vst [vmem:[#allocation7 + $0x88] sm:$0xff] %v1967_v48   ;;  %v975_v52 = vunpack.c.l.bf16 %v654_v46  ;;  %v976_v55 = vunpack.c.h.bf16 %v654_v46 }
 0x121   :  { %1446 = vst [vmem:[#allocation7] sm:$0xff] %v653_v50   ;;  %v973_v53 = vunpack.c.l.bf16 %v653_v50  ;;  %v974_v54 = vunpack.c.h.bf16 %v653_v50  ;;  %1617 = vst [vmem:[#allocation7 + $0x80] sm:$0xff] %v1969_v51  }
 0x122   :  { %v1108_v63 = vmul.f32 %v975_v52, %v975_v52  ;;  %v1109_v4 = vmul.f32 %v976_v55, %v976_v55 }
 0x123   :  { %v1037_v56 = vadd.f32 %v974_v54, %v973_v53  ;;  %v1106_v57 = vmul.f32 %v973_v53, %v973_v53  ;;  %v1107_v58 = vmul.f32 %v974_v54, %v974_v54  ;;  %v1695_v59 = vpop.f32.mrb[4].mxu0  ;;  %v1727_v60 = vpop.f32.mrb[4].mxu1 }
 0x124   :  { %v414_v61 = vpop.f32.mrb[5].mxu0  ;;  %v542_v62 = vpop.f32.mrb[5].mxu1 }
 0x125   :  { %v1038_v0 = vadd.f32 %v1037_v56, %v975_v52  ;;  %v1170_v1 = vadd.f32 %v1107_v58, %v1106_v57  ;;  %v1696_v2 = vpop.f32.mrb[6].mxu0  ;;  %v1728_v3 = vpop.f32.mrb[6].mxu1 }
 0x126   :  { %v656_v5 = vpack.c.bf16 %v1696_v2, %v1695_v59  ;;  %v417_v6 = vpop.f32.mrb[7].mxu0  ;;  %v1973_v7 = vpack.c.bf16 %v1728_v3, %v1727_v60  ;;  %v545_v8 = vpop.f32.mrb[7].mxu1 }
 0x127   :  { %v1171_v9 = vadd.f32 %v1170_v1, %v1108_v63  ;;  %v655_v10 = vpack.c.bf16 %v417_v6, %v414_v61  ;;  %v1039_v11 = vadd.f32 %v1038_v0, %v976_v55  ;;  %v1975_v12 = vpack.c.bf16 %v545_v8, %v542_v62 }
 0x128   :  { %1604 = vst [vmem:[#allocation7 + $0x18] sm:$0xff] %v656_v5   ;;  %1620 = vst [vmem:[#allocation7 + $0x98] sm:$0xff] %v1973_v7   ;;  %v979_v16 = vunpack.c.l.bf16 %v656_v5  ;;  %v980_v21 = vunpack.c.h.bf16 %v656_v5 }
 0x129   :  { %1603 = vst [vmem:[#allocation7 + $0x10] sm:$0xff] %v655_v10   ;;  %v977_v13 = vunpack.c.l.bf16 %v655_v10  ;;  %v978_v14 = vunpack.c.h.bf16 %v655_v10  ;;  %v1172_v15 = vadd.f32 %v1171_v9, %v1109_v4  ;;  %1619 = vst [vmem:[#allocation7 + $0x90] sm:$0xff] %v1975_v12  }
 0x12a   :  { %v1112_v29 = vmul.f32 %v979_v16, %v979_v16  ;;  %v1113_v38 = vmul.f32 %v980_v21, %v980_v21 }
 0x12b   :  { %v1040_v17 = vadd.f32 %v1039_v11, %v977_v13  ;;  %v1110_v18 = vmul.f32 %v977_v13, %v977_v13  ;;  %v1699_v19 = vpop.f32.mrb[8].mxu0  ;;  %v1731_v20 = vpop.f32.mrb[8].mxu1  ;;  %v1111_v25 = vmul.f32 %v978_v14, %v978_v14 }
 0x12c   :  { %v430_v22 = vpop.f32.mrb[9].mxu0  ;;  %v558_v23 = vpop.f32.mrb[9].mxu1 }
 0x12d   :  { %v1041_v24 = vadd.f32 %v1040_v17, %v978_v14  ;;  %v1173_v26 = vadd.f32 %v1172_v15, %v1110_v18  ;;  %v1700_v27 = vpop.f32.mrb[10].mxu0  ;;  %v1732_v28 = vpop.f32.mrb[10].mxu1 }
 0x12e   :  { %v658_v30 = vpack.c.bf16 %v1700_v27, %v1699_v19  ;;  %v433_v31 = vpop.f32.mrb[11].mxu0  ;;  %v1979_v32 = vpack.c.bf16 %v1732_v28, %v1731_v20  ;;  %v561_v33 = vpop.f32.mrb[11].mxu1 }
 0x12f   :  { %v1042_v34 = vadd.f32 %v1041_v24, %v979_v16  ;;  %v1174_v35 = vadd.f32 %v1173_v26, %v1111_v25  ;;  %v657_v36 = vpack.c.bf16 %v433_v31, %v430_v22  ;;  %v1981_v37 = vpack.c.bf16 %v561_v33, %v558_v23 }
 0x130   :  { %1606 = vst [vmem:[#allocation7 + $0x28] sm:$0xff] %v658_v30   ;;  %1622 = vst [vmem:[#allocation7 + $0xa8] sm:$0xff] %v1979_v32   ;;  %v983_v43 = vunpack.c.l.bf16 %v658_v30  ;;  %v984_v50 = vunpack.c.h.bf16 %v658_v30 }
 0x131   :  { %v1175_v39 = vadd.f32 %v1174_v35, %v1112_v29  ;;  %1605 = vst [vmem:[#allocation7 + $0x20] sm:$0xff] %v657_v36   ;;  %v981_v40 = vunpack.c.l.bf16 %v657_v36  ;;  %v982_v41 = vunpack.c.h.bf16 %v657_v36  ;;  %v1043_v42 = vadd.f32 %v1042_v34, %v980_v21  ;;  %1621 = vst [vmem:[#allocation7 + $0xa0] sm:$0xff] %v1981_v37  }
 0x132   :  { %v1116_v59 = vmul.f32 %v983_v43, %v983_v43  ;;  %v1117_v4 = vmul.f32 %v984_v50, %v984_v50 }
 0x133   :  { %v1044_v44 = vadd.f32 %v1043_v42, %v981_v40  ;;  %v1114_v45 = vmul.f32 %v981_v40, %v981_v40  ;;  %v1176_v46 = vadd.f32 %v1175_v39, %v1113_v38  ;;  %v1703_v47 = vpop.f32.mrb[12].mxu0  ;;  %v1735_v49 = vpop.f32.mrb[12].mxu1  ;;  %v1115_v55 = vmul.f32 %v982_v41, %v982_v41 }
 0x134   :  { %v446_v52 = vpop.f32.mrb[13].mxu0  ;;  %v574_v53 = vpop.f32.mrb[13].mxu1 }
 0x135   :  { %v1045_v54 = vadd.f32 %v1044_v44, %v982_v41  ;;  %v1177_v56 = vadd.f32 %v1176_v46, %v1114_v45  ;;  %v1704_v57 = vpop.f32.mrb[14].mxu0  ;;  %v1736_v58 = vpop.f32.mrb[14].mxu1 }
 0x136   :  { %v660_v60 = vpack.c.bf16 %v1704_v57, %v1703_v47  ;;  %v449_v61 = vpop.f32.mrb[15].mxu0  ;;  %v1985_v62 = vpack.c.bf16 %v1736_v58, %v1735_v49  ;;  %v577_v63 = vpop.f32.mrb[15].mxu1 }
 0x137   :  { %v1046_v0 = vadd.f32 %v1045_v54, %v983_v43  ;;  %v1178_v1 = vadd.f32 %v1177_v56, %v1115_v55  ;;  %v659_v2 = vpack.c.bf16 %v449_v61, %v446_v52  ;;  %v1987_v3 = vpack.c.bf16 %v577_v63, %v574_v53 }
 0x138   :  { %1608 = vst [vmem:[#allocation7 + $0x38] sm:$0xff] %v660_v60   ;;  %1624 = vst [vmem:[#allocation7 + $0xb8] sm:$0xff] %v1985_v62   ;;  %v987_v10 = vunpack.c.l.bf16 %v660_v60  ;;  %v988_v17 = vunpack.c.h.bf16 %v660_v60 }
 0x139   :  { %v1179_v5 = vadd.f32 %v1178_v1, %v1116_v59  ;;  %1607 = vst [vmem:[#allocation7 + $0x30] sm:$0xff] %v659_v2   ;;  %v985_v6 = vunpack.c.l.bf16 %v659_v2  ;;  %v986_v8 = vunpack.c.h.bf16 %v659_v2  ;;  %v1047_v9 = vadd.f32 %v1046_v0, %v984_v50  ;;  %1623 = vst [vmem:[#allocation7 + $0xb0] sm:$0xff] %v1987_v3  }
 0x13a   :  { %v1120_v25 = vmul.f32 %v987_v10, %v987_v10  ;;  %v1121_v35 = vmul.f32 %v988_v17, %v988_v17 }
 0x13b   :  { %v1048_v11 = vadd.f32 %v1047_v9, %v985_v6  ;;  %v1118_v13 = vmul.f32 %v985_v6, %v985_v6  ;;  %v1180_v14 = vadd.f32 %v1179_v5, %v1117_v4  ;;  %v1707_v15 = vpop.f32.mrb[16].mxu0  ;;  %v1739_v16 = vpop.f32.mrb[16].mxu1  ;;  %v1119_v21 = vmul.f32 %v986_v8, %v986_v8 }
 0x13c   :  { %v462_v18 = vpop.f32.mrb[17].mxu0  ;;  %v590_v19 = vpop.f32.mrb[17].mxu1 }
 0x13d   :  { %v1049_v20 = vadd.f32 %v1048_v11, %v986_v8  ;;  %v1181_v22 = vadd.f32 %v1180_v14, %v1118_v13  ;;  %v1708_v23 = vpop.f32.mrb[18].mxu0  ;;  %v1740_v24 = vpop.f32.mrb[18].mxu1 }
 0x13e   :  { %v662_v26 = vpack.c.bf16 %v1708_v23, %v1707_v15  ;;  %v465_v27 = vpop.f32.mrb[19].mxu0  ;;  %v1991_v28 = vpack.c.bf16 %v1740_v24, %v1739_v16  ;;  %v593_v29 = vpop.f32.mrb[19].mxu1 }
 0x13f   :  { %v1050_v30 = vadd.f32 %v1049_v20, %v987_v10  ;;  %v1182_v31 = vadd.f32 %v1181_v22, %v1119_v21  ;;  %v661_v33 = vpack.c.bf16 %v465_v27, %v462_v18  ;;  %v1993_v34 = vpack.c.bf16 %v593_v29, %v590_v19 }
 0x140   :  { %1610 = vst [vmem:[#allocation7 + $0x48] sm:$0xff] %v662_v26   ;;  %1626 = vst [vmem:[#allocation7 + $0xc8] sm:$0xff] %v1991_v28   ;;  %v991_v41 = vunpack.c.l.bf16 %v662_v26  ;;  %v992_v47 = vunpack.c.h.bf16 %v662_v26 }
 0x141   :  { %v1183_v36 = vadd.f32 %v1182_v31, %v1120_v25  ;;  %1609 = vst [vmem:[#allocation7 + $0x40] sm:$0xff] %v661_v33   ;;  %v989_v38 = vunpack.c.l.bf16 %v661_v33  ;;  %v990_v39 = vunpack.c.h.bf16 %v661_v33  ;;  %v1051_v40 = vadd.f32 %v1050_v30, %v988_v17  ;;  %1625 = vst [vmem:[#allocation7 + $0xc0] sm:$0xff] %v1993_v34  }
 0x142   :  { %v1124_v57 = vmul.f32 %v991_v41, %v991_v41  ;;  %v1125_v4 = vmul.f32 %v992_v47, %v992_v47 }
 0x143   :  { %v1052_v42 = vadd.f32 %v1051_v40, %v989_v38  ;;  %v1122_v43 = vmul.f32 %v989_v38, %v989_v38  ;;  %v1184_v44 = vadd.f32 %v1183_v36, %v1121_v35  ;;  %v1711_v45 = vpop.f32.mrb[20].mxu0  ;;  %v1743_v46 = vpop.f32.mrb[20].mxu1  ;;  %v1123_v53 = vmul.f32 %v990_v39, %v990_v39 }
 0x144   :  { %v478_v49 = vpop.f32.mrb[21].mxu0  ;;  %v606_v50 = vpop.f32.mrb[21].mxu1 }
 0x145   :  { %v1053_v52 = vadd.f32 %v1052_v42, %v990_v39  ;;  %v1185_v54 = vadd.f32 %v1184_v44, %v1122_v43  ;;  %v1712_v55 = vpop.f32.mrb[22].mxu0  ;;  %v1744_v56 = vpop.f32.mrb[22].mxu1 }
 0x146   :  { %v664_v58 = vpack.c.bf16 %v1712_v55, %v1711_v45  ;;  %v481_v59 = vpop.f32.mrb[23].mxu0  ;;  %v1997_v60 = vpack.c.bf16 %v1744_v56, %v1743_v46  ;;  %v609_v61 = vpop.f32.mrb[23].mxu1 }
 0x147   :  { %v1054_v63 = vadd.f32 %v1053_v52, %v991_v41  ;;  %v1186_v0 = vadd.f32 %v1185_v54, %v1123_v53  ;;  %v663_v1 = vpack.c.bf16 %v481_v59, %v478_v49  ;;  %v1999_v2 = vpack.c.bf16 %v609_v61, %v606_v50 }
 0x148   :  { %1612 = vst [vmem:[#allocation7 + $0x58] sm:$0xff] %v664_v58   ;;  %1628 = vst [vmem:[#allocation7 + $0xd8] sm:$0xff] %v1997_v60   ;;  %v995_v10 = vunpack.c.l.bf16 %v664_v58  ;;  %v996_v17 = vunpack.c.h.bf16 %v664_v58 }
 0x149   :  { %v1187_v5 = vadd.f32 %v1186_v0, %v1124_v57  ;;  %1611 = vst [vmem:[#allocation7 + $0x50] sm:$0xff] %v663_v1   ;;  %v993_v6 = vunpack.c.l.bf16 %v663_v1  ;;  %v994_v8 = vunpack.c.h.bf16 %v663_v1  ;;  %v1055_v9 = vadd.f32 %v1054_v63, %v992_v47  ;;  %1627 = vst [vmem:[#allocation7 + $0xd0] sm:$0xff] %v1999_v2  }
 0x14a   :  { %v1128_v25 = vmul.f32 %v995_v10, %v995_v10  ;;  %v1129_v38 = vmul.f32 %v996_v17, %v996_v17 }
 0x14b   :  { %v1056_v11 = vadd.f32 %v1055_v9, %v993_v6  ;;  %v1126_v13 = vmul.f32 %v993_v6, %v993_v6  ;;  %v1188_v14 = vadd.f32 %v1187_v5, %v1125_v4  ;;  %v1715_v15 = vpop.f32.mrb[24].mxu0  ;;  %v1747_v16 = vpop.f32.mrb[24].mxu1  ;;  %v1127_v21 = vmul.f32 %v994_v8, %v994_v8 }
 0x14c   :  { %v494_v18 = vpop.f32.mrb[25].mxu0  ;;  %v622_v19 = vpop.f32.mrb[25].mxu1 }
 0x14d   :  { %v1057_v20 = vadd.f32 %v1056_v11, %v994_v8  ;;  %v1189_v22 = vadd.f32 %v1188_v14, %v1126_v13  ;;  %v1716_v23 = vpop.f32.mrb[26].mxu0  ;;  %v1748_v24 = vpop.f32.mrb[26].mxu1 }
 0x14e   :  { %v666_v26 = vpack.c.bf16 %v1716_v23, %v1715_v15  ;;  %v497_v27 = vpop.f32.mrb[27].mxu0  ;;  %v2003_v29 = vpack.c.bf16 %v1748_v24, %v1747_v16  ;;  %v625_v30 = vpop.f32.mrb[27].mxu1 }
 0x14f   :  { %v1058_v31 = vadd.f32 %v1057_v20, %v995_v10  ;;  %v1190_v33 = vadd.f32 %v1189_v22, %v1127_v21  ;;  %v665_v35 = vpack.c.bf16 %v497_v27, %v494_v18  ;;  %v2005_v36 = vpack.c.bf16 %v625_v30, %v622_v19 }
 0x150   :  { %1614 = vst [vmem:[#allocation7 + $0x68] sm:$0xff] %v666_v26   ;;  %1630 = vst [vmem:[#allocation7 + $0xe8] sm:$0xff] %v2003_v29   ;;  %v999_v43 = vunpack.c.l.bf16 %v666_v26  ;;  %v1000_v50 = vunpack.c.h.bf16 %v666_v26 }
 0x151   :  { %v1191_v39 = vadd.f32 %v1190_v33, %v1128_v25  ;;  %1613 = vst [vmem:[#allocation7 + $0x60] sm:$0xff] %v665_v35   ;;  %v997_v40 = vunpack.c.l.bf16 %v665_v35  ;;  %v998_v41 = vunpack.c.h.bf16 %v665_v35  ;;  %v1059_v42 = vadd.f32 %v1058_v31, %v996_v17  ;;  %1629 = vst [vmem:[#allocation7 + $0xe0] sm:$0xff] %v2005_v36  }
 0x152   :  { %v1132_v59 = vmul.f32 %v999_v43, %v999_v43  ;;  %v1133_v9 = vmul.f32 %v1000_v50, %v1000_v50 }
 0x153   :  { %v1060_v44 = vadd.f32 %v1059_v42, %v997_v40  ;;  %v1130_v45 = vmul.f32 %v997_v40, %v997_v40  ;;  %v1192_v46 = vadd.f32 %v1191_v39, %v1129_v38  ;;  %v1719_v47 = vpop.f32.mrb[28].mxu0  ;;  %v1751_v49 = vpop.f32.mrb[28].mxu1  ;;  %v1131_v55 = vmul.f32 %v998_v41, %v998_v41 }
 0x154   :  { %v510_v52 = vpop.f32.mrb[29].mxu0  ;;  %v638_v53 = vpop.f32.mrb[29].mxu1 }
 0x155   :  { %v1061_v54 = vadd.f32 %v1060_v44, %v998_v41  ;;  %v1193_v56 = vadd.f32 %v1192_v46, %v1130_v45  ;;  %v1720_v57 = vpop.f32.mrb[30].mxu0  ;;  %v1752_v58 = vpop.f32.mrb[30].mxu1 }
 0x156   :  { %v668_v61 = vpack.c.bf16 %v1720_v57, %v1719_v47  ;;  %v513_v63 = vpop.f32.mrb[31].mxu0  ;;  %v2009_v0 = vpack.c.bf16 %v1752_v58, %v1751_v49  ;;  %v641_v1 = vpop.f32.mrb[31].mxu1 }
 0x157   :  { %v1062_v4 = vadd.f32 %v1061_v54, %v999_v43  ;;  %v1194_v5 = vadd.f32 %v1193_v56, %v1131_v55  ;;  %v667_v6 = vpack.c.bf16 %v513_v63, %v510_v52  ;;  %v2011_v8 = vpack.c.bf16 %v641_v1, %v638_v53 }
 0x158   :  { %1616 = vst [vmem:[#allocation7 + $0x78] sm:$0xff] %v668_v61   ;;  %1632 = vst [vmem:[#allocation7 + $0xf8] sm:$0xff] %v2009_v0  }
 0x159   :  { %v1195_v10 = vadd.f32 %v1194_v5, %v1132_v59  ;;  %1615 = vst [vmem:[#allocation7 + $0x70] sm:$0xff] %v667_v6   ;;  %v1001_v11 = vunpack.c.l.bf16 %v667_v6  ;;  %v1002_v13 = vunpack.c.h.bf16 %v667_v6  ;;  %v1063_v14 = vadd.f32 %v1062_v4, %v1000_v50  ;;  %1631 = vst [vmem:[#allocation7 + $0xf0] sm:$0xff] %v2011_v8  }
 0x15a   :  { %1870 = shalt.err (!%p1867_p6)
}
 0x15b   :  { %s1871_s14 = scalar_lea.hbm %s2076_s2, 4096 }
 0x15c   :  { %p1872_p7 = scmp.ne.s32.totalorder %s2076_s2, %s1871_s14  ;;  %p1875_p8 = scmp.lt.u32.totalorder %s1871_s14, %s2076_s2 }
 0x15e   :  { %p1877_p9 = pnand %p1875_p8, %p1872_p7 }
 0x160   :  { %1880 = shalt.err (!%p1877_p9)
}
 0x161   :  { %1253 = dma.vmem_to_hbm [thread:$0]  %s1248_s10, 4096, %s2076_s2, [#allocation4], %s1912_s22, %s1912_s22, %s1913_s23   ;;  %v1003_v15 = vunpack.c.l.bf16 %v668_v61  ;;  %v1064_v16 = vadd.f32 %v1063_v14, %v1001_v11  ;;  %v1134_v17 = vmul.f32 %v1001_v11, %v1001_v11  ;;  %v1196_v18 = vadd.f32 %v1195_v10, %v1133_v9 }
 0x162   :  { %v1004_v19 = vunpack.c.h.bf16 %v668_v61  ;;  %v1135_v21 = vmul.f32 %v1002_v13, %v1002_v13  ;;  %v1005_v26 = vunpack.c.l.bf16 %v1969_v51  ;;  %v1006_v31 = vunpack.c.h.bf16 %v1969_v51  ;;  %s1916_s2 = smov [#allocation8]  }
 0x163   :  { %v1065_v20 = vadd.f32 %v1064_v16, %v1002_v13  ;;  %v1197_v22 = vadd.f32 %v1196_v18, %v1134_v17  ;;  %v1136_v23 = vmul.f32 %v1003_v15, %v1003_v15  ;;  %v1007_v35 = vunpack.c.l.bf16 %v1967_v48  ;;  %s1260_s21 = sshll.u32 %s1916_s2, 4  ;;  %s1261_s21 = int_to_ptr.vmem [resolvable:$true] %s1260_s21 }
 0x164   :  { %v1137_v27 = vmul.f32 %v1004_v19, %v1004_v19  ;;  %v1138_v39 = vmul.f32 %v1005_v26, %v1005_v26  ;;  %v1008_v41 = vunpack.c.h.bf16 %v1967_v48  ;;  %v1139_v43 = vmul.f32 %v1006_v31, %v1006_v31  ;;  %s1881_s22 = scalar_lea.vmem %s1261_s21, 32  ;;  %p1886_p11 = scmp.lt.s32.totalorder %s1261_s21, %s1261_s21 }
 0x165   :  { %v1066_v24 = vadd.f32 %v1065_v20, %v1003_v15  ;;  %v1198_v25 = vadd.f32 %v1197_v22, %v1135_v21  ;;  %v1140_v45 = vmul.f32 %v1007_v35, %v1007_v35  ;;  %v1009_v49 = vunpack.c.l.bf16 %v1975_v12  ;;  %p1882_p10 = scmp.ne.s32.totalorder %s1261_s21, %s1881_s22  ;;  %p1887_p12 = scmp.lt.s32.totalorder %s1881_s22, %s1881_s22 }
 0x166   :  { %v1141_v50 = vmul.f32 %v1008_v41, %v1008_v41  ;;  %v1010_v51 = vunpack.c.h.bf16 %v1975_v12  ;;  %v1011_v54 = vunpack.c.l.bf16 %v1973_v7  ;;  %v1012_v48 = vunpack.c.h.bf16 %v1973_v7 }
 0x167   :  { %v1199_v30 = vadd.f32 %v1198_v25, %v1136_v23  ;;  %v1067_v33 = vadd.f32 %v1066_v24, %v1004_v19  ;;  %v1142_v56 = vmul.f32 %v1009_v49, %v1009_v49  ;;  %v1013_v5 = vunpack.c.l.bf16 %v1981_v37  ;;  %p1888_p13 = por %p1887_p12, %p1886_p11 }
 0x168   :  { %v1143_v59 = vmul.f32 %v1010_v51, %v1010_v51  ;;  %v1144_v63 = vmul.f32 %v1011_v54, %v1011_v54  ;;  %v1145_v6 = vmul.f32 %v1012_v48, %v1012_v48  ;;  %v1014_v12 = vunpack.c.h.bf16 %v1981_v37 }
 0x169   :  { %v1068_v38 = vadd.f32 %v1067_v33, %v1005_v26  ;;  %v1200_v40 = vadd.f32 %v1199_v30, %v1137_v27  ;;  %v1015_v11 = vunpack.c.l.bf16 %v1979_v32  ;;  %v1146_v14 = vmul.f32 %v1013_v5, %v1013_v5  ;;  %p1889_p0 = pnand %p1888_p13, %p1882_p10 }
 0x16a   :  { %v1016_v7 = vunpack.c.h.bf16 %v1979_v32  ;;  %v1147_v17 = vmul.f32 %v1014_v12, %v1014_v12  ;;  %v1017_v22 = vunpack.c.l.bf16 %v1987_v3  ;;  %v1018_v37 = vunpack.c.h.bf16 %v1987_v3 }
 0x16b   :  { %v1069_v42 = vadd.f32 %v1068_v38, %v1006_v31  ;;  %v1201_v44 = vadd.f32 %v1200_v40, %v1138_v39  ;;  %v1148_v19 = vmul.f32 %v1015_v11, %v1015_v11  ;;  %v1019_v26 = vunpack.c.l.bf16 %v1985_v62 }
 0x16c   :  { %v1149_v23 = vmul.f32 %v1016_v7, %v1016_v7  ;;  %v1150_v30 = vmul.f32 %v1017_v22, %v1017_v22  ;;  %v1020_v32 = vunpack.c.h.bf16 %v1985_v62  ;;  %v1022_v3 = vunpack.c.h.bf16 %v1993_v34 }
 0x16d   :  { %v1070_v46 = vadd.f32 %v1069_v42, %v1007_v35  ;;  %v1202_v47 = vadd.f32 %v1201_v44, %v1139_v43  ;;  %v1151_v35 = vmul.f32 %v1018_v37, %v1018_v37  ;;  %v1152_v39 = vmul.f32 %v1019_v26, %v1019_v26 }
 0x16e   :  { %v1021_v42 = vunpack.c.l.bf16 %v1993_v34  ;;  %v1153_v43 = vmul.f32 %v1020_v32, %v1020_v32  ;;  %v1024_v62 = vunpack.c.h.bf16 %v1991_v28  ;;  %v1026_v34 = vunpack.c.h.bf16 %v1999_v2 }
 0x16f   :  { %v1203_v52 = vadd.f32 %v1202_v47, %v1140_v45  ;;  %v1071_v53 = vadd.f32 %v1070_v46, %v1008_v41  ;;  %v1023_v46 = vunpack.c.l.bf16 %v1991_v28  ;;  %v1028_v28 = vunpack.c.h.bf16 %v1997_v60 }
 0x170   :  { %vm1239_vm0 = vcmask 1040384  }
 0x171   :  { %v1072_v55 = vadd.f32 %v1071_v53, %v1009_v49  ;;  %v1204_v57 = vadd.f32 %v1203_v52, %v1141_v50  ;;  %v1154_v49 = vmul.f32 %v1021_v42, %v1021_v42 }
 0x173   :  { %v1073_v58 = vadd.f32 %v1072_v55, %v1010_v51  ;;  %v1205_v61 = vadd.f32 %v1204_v57, %v1142_v56  ;;  %v1155_v51 = vmul.f32 %v1022_v3, %v1022_v3  ;;  %v1025_v57 = vunpack.c.l.bf16 %v1999_v2 }
 0x174   :  { %v1030_v2 = vunpack.c.h.bf16 %v2005_v36 }
 0x175   :  { %v1074_v1 = vadd.f32 %v1073_v58, %v1011_v54  ;;  %v1206_v4 = vadd.f32 %v1205_v61, %v1143_v59  ;;  %v1156_v54 = vmul.f32 %v1023_v46, %v1023_v46  ;;  %v1027_v61 = vunpack.c.l.bf16 %v1997_v60 }
 0x176   :  { %v1032_v60 = vunpack.c.h.bf16 %v2003_v29 }
 0x177   :  { %v1207_v9 = vadd.f32 %v1206_v4, %v1144_v63  ;;  %v1075_v10 = vadd.f32 %v1074_v1, %v1012_v48  ;;  %v1157_v48 = vmul.f32 %v1024_v62, %v1024_v62  ;;  %v1158_v1 = vmul.f32 %v1025_v57, %v1025_v57 }
 0x179   :  { %v1076_v13 = vadd.f32 %v1075_v10, %v1013_v5  ;;  %v1208_v15 = vadd.f32 %v1207_v9, %v1145_v6  ;;  %v1159_v6 = vmul.f32 %v1026_v34, %v1026_v34 }
 0x17b   :  { %v1077_v16 = vadd.f32 %v1076_v13, %v1014_v12  ;;  %v1209_v18 = vadd.f32 %v1208_v15, %v1146_v14  ;;  %v1160_v12 = vmul.f32 %v1027_v61, %v1027_v61  ;;  %v1029_v13 = vunpack.c.l.bf16 %v2005_v36 }
 0x17c   :  { %v1161_v14 = vmul.f32 %v1028_v28, %v1028_v28  ;;  %v1034_v36 = vunpack.c.h.bf16 %v2011_v8 }
 0x17d   :  { %v1078_v20 = vadd.f32 %v1077_v16, %v1015_v11  ;;  %v1210_v21 = vadd.f32 %v1209_v18, %v1147_v17  ;;  %v1031_v16 = vunpack.c.l.bf16 %v2003_v29  ;;  %v1162_v18 = vmul.f32 %v1029_v13, %v1029_v13 }
 0x17e   :  { %v1036_v29 = vunpack.c.h.bf16 %v2009_v0 }
 0x17f   :  { %v1211_v24 = vadd.f32 %v1210_v21, %v1148_v19  ;;  %v1079_v25 = vadd.f32 %v1078_v20, %v1016_v7  ;;  %v1163_v21 = vmul.f32 %v1030_v2, %v1030_v2 }
 0x181   :  { %v1080_v27 = vadd.f32 %v1079_v25, %v1017_v22  ;;  %v1212_v31 = vadd.f32 %v1211_v24, %v1149_v23  ;;  %v1164_v23 = vmul.f32 %v1031_v16, %v1031_v16  ;;  %v1033_v25 = vunpack.c.l.bf16 %v2011_v8 }
 0x183   :  { %v1081_v33 = vadd.f32 %v1080_v27, %v1018_v37  ;;  %v1213_v38 = vadd.f32 %v1212_v31, %v1150_v30  ;;  %v1035_v31 = vunpack.c.l.bf16 %v2009_v0 }
 0x185   :  { %v1082_v40 = vadd.f32 %v1081_v33, %v1019_v26  ;;  %v1214_v41 = vadd.f32 %v1213_v38, %v1151_v35  ;;  %v1165_v26 = vmul.f32 %v1032_v60, %v1032_v60  ;;  %v1166_v33 = vmul.f32 %v1033_v25, %v1033_v25 }
 0x187   :  { %v1215_v44 = vadd.f32 %v1214_v41, %v1152_v39  ;;  %v1083_v45 = vadd.f32 %v1082_v40, %v1020_v32  ;;  %v1167_v39 = vmul.f32 %v1034_v36, %v1034_v36  ;;  %v1168_v41 = vmul.f32 %v1035_v31, %v1035_v31 }
 0x189   :  { %v1084_v47 = vadd.f32 %v1083_v45, %v1021_v42  ;;  %v1216_v50 = vadd.f32 %v1215_v44, %v1153_v43  ;;  %v1169_v44 = vmul.f32 %v1036_v29, %v1036_v29 }
 0x18b   :  { %v1085_v52 = vadd.f32 %v1084_v47, %v1022_v3  ;;  %v1217_v53 = vadd.f32 %v1216_v50, %v1154_v49 }
 0x18d   :  { %v1086_v55 = vadd.f32 %v1085_v52, %v1023_v46  ;;  %v1218_v56 = vadd.f32 %v1217_v53, %v1155_v51 }
 0x18f   :  { %v1219_v58 = vadd.f32 %v1218_v56, %v1156_v54  ;;  %v1087_v59 = vadd.f32 %v1086_v55, %v1024_v62 }
 0x191   :  { %v1088_v63 = vadd.f32 %v1087_v59, %v1025_v57  ;;  %v1220_v4 = vadd.f32 %v1219_v58, %v1157_v48 }
 0x193   :  { %v1089_v5 = vadd.f32 %v1088_v63, %v1026_v34  ;;  %v1221_v9 = vadd.f32 %v1220_v4, %v1158_v1 }
 0x195   :  { %v1090_v10 = vadd.f32 %v1089_v5, %v1027_v61  ;;  %v1222_v11 = vadd.f32 %v1221_v9, %v1159_v6 }
 0x197   :  { %v1223_v15 = vadd.f32 %v1222_v11, %v1160_v12  ;;  %v1091_v7 = vadd.f32 %v1090_v10, %v1028_v28 }
 0x199   :  { %v1092_v17 = vadd.f32 %v1091_v7, %v1029_v13  ;;  %v1224_v19 = vadd.f32 %v1223_v15, %v1161_v14 }
 0x19b   :  { %v1093_v20 = vadd.f32 %v1092_v17, %v1030_v2  ;;  %v1225_v22 = vadd.f32 %v1224_v19, %v1162_v18 }
 0x19d   :  { %v1094_v24 = vadd.f32 %v1093_v20, %v1031_v16  ;;  %v1226_v37 = vadd.f32 %v1225_v22, %v1163_v21 }
 0x19f   :  { %v1227_v27 = vadd.f32 %v1226_v37, %v1164_v23  ;;  %v1095_v30 = vadd.f32 %v1094_v24, %v1032_v60 }
 0x1a1   :  { %v1096_v32 = vadd.f32 %v1095_v30, %v1033_v25  ;;  %v1228_v35 = vadd.f32 %v1227_v27, %v1165_v26 }
 0x1a3   :  { %v1097_v38 = vadd.f32 %v1096_v32, %v1034_v36  ;;  %v1229_v40 = vadd.f32 %v1228_v35, %v1166_v33 }
 0x1a5   :  { %v1098_v42 = vadd.f32 %v1097_v38, %v1035_v31  ;;  %v1230_v43 = vadd.f32 %v1229_v40, %v1167_v39 }
 0x1a7   :  { %v1099_v3 = vadd.f32 %v1098_v42, %v1036_v29  ;;  %v1231_v45 = vadd.f32 %v1230_v43, %v1168_v41 }
 0x1a9   :  { %v1100_v46 = vrot.slane %v1099_v3, 4  ;;  %v1232_v47 = vadd.f32 %v1231_v45, %v1169_v44 }
 0x1ab   :  { %v1101_v8 = vadd.f32 %v1100_v46, %v1099_v3  ;;  %v1233_v49 = vrot.slane %v1232_v47, 4 }
 0x1ad   :  { %v1102_v50 = vrot.slane %v1101_v8, 2  ;;  %v1234_v62 = vadd.f32 %v1233_v49, %v1232_v47 }
 0x1af   :  { %v1103_v52 = vadd.f32 %v1102_v50, %v1101_v8  ;;  %v1235_v51 = vrot.slane %v1234_v62, 2 }
 0x1b1   :  { %v1104_v53 = vrot.slane %v1103_v52, 1  ;;  %v1236_v54 = vadd.f32 %v1235_v51, %v1234_v62 }
 0x1b3   :  { %v1237_v0 = vrot.slane %v1236_v54, 1  ;;  %v1105_v55 = vadd.f32 %v1104_v53, %v1103_v52 }
 0x1b5   :  { %v1238_v56 = vadd.f32 %v1237_v0, %v1236_v54 }
 0x1b7   :  { %v1240_v57 = vsel %vm1239_vm0, %v1105_v55, %v1238_v56 }
 0x1b8   :  { %1241 = vst [vmem:[#allocation8] sm:$0x3] %v1240_v57 }
 0x1b9   :  { %1892 = shalt.err (!%p1889_p0)
}
 0x1ba   :  { %s1893_s25 = scalar_lea.hbm %s2077_s3, 32 }
 0x1bb   :  { %p1894_p1 = scmp.ne.s32.totalorder %s2077_s3, %s1893_s25  ;;  %p1897_p2 = scmp.lt.u32.totalorder %s1893_s25, %s2077_s3 }
 0x1bd   :  { %p1899_p3 = pnand %p1897_p2, %p1894_p1 }
 0x1bf   :  { %1902 = shalt.err (!%p1899_p3)
}
 0x1c0   :  { %1263 = dma.vmem_to_hbm [thread:$0]  %s1261_s21, 32, %s2077_s3, [#allocation9]  }
 0x1c1   :  { %1907 = dma.done.wait [#allocation4], 4096  }
 0x1c2   :  { %1908 = vsyncadd [#allocation4], 4294963200 }
 0x1c3   :  { %1909 = dma.done.wait [#allocation9], 32  }
 0x1c4   :  { %1910 = vsyncadd [#allocation9], 4294967264 }
 0x1c5   :  { %1270 = vsyncpa [#allocation3], 1 }
 0x1c6   :  { %1271 = vsyncpa [#allocation6], 1 }
 0x1c7   :  { %1272 = vsyncpa [#allocation4], 1 }
 0x1c8   :  { %1273 = vsyncpa [#allocation9], 1 }

</bundles_post_ra>
